<compile_context>
chip_gen: v7x
topology: tpu7x:2x2x1
jax: 0.10.0
libtpu: 0.0.40
codegen_flags: <defaults>
</compile_context>

<pallas_src>
import jax
import jax.numpy as jnp
from jax.experimental import pallas as pl
from jax.experimental.pallas import tpu as pltpu

HIDDEN = 256
LANE = 128      # lane width / output padding granularity
SUBLANE = 16    # bf16 sublane packing -> pad batch to a multiple of this


def _round_up(x, m):
    return ((x + m - 1) // m) * m


# ----------------------------- Pallas kernel ------------------------------ #
def _fused_heads_kernel(sa_ref, w1_ref, w2_ref, b2_ref, w3_ref, b3_ref, out_ref):
    """Single invocation: all Q-heads unrolled with a static Python loop.

    sa_ref : (B_PAD, IN_PAD)        bf16  (ones column at index sa_dim folds b1)
    w1_ref : (H, IN_PAD, HIDDEN)    bf16  (b1 folded into row sa_dim)
    w2_ref : (H, HIDDEN, HIDDEN)    bf16   b2_ref: (H, 1, HIDDEN) f32
    w3_ref : (H, HIDDEN, OUT_PAD)   bf16   b3_ref: (H, 1, OUT_PAD) f32
    out_ref: (H, B_PAD, OUT_PAD)    f32
    """
    sa = sa_ref[...]                                           # resident in VMEM
    num_heads = w1_ref.shape[0]
    for h in range(num_heads):                                 # static unroll
        a1 = jnp.dot(sa, w1_ref[h], preferred_element_type=jnp.float32)
        a1 = jnp.maximum(a1, 0.0)                              # b1 already folded in
        a2 = jnp.dot(a1.astype(jnp.bfloat16), w2_ref[h],
                     preferred_element_type=jnp.float32)
        a2 = jnp.maximum(a2 + b2_ref[h], 0.0)
        o = jnp.dot(a2.astype(jnp.bfloat16), w3_ref[h],
                    preferred_element_type=jnp.float32) + b3_ref[h]
        out_ref[h] = o.astype(out_ref.dtype)                   # lane-dense store


def fused_heads(sa_pad, W1, W2, B2, W3, B3):
    """Run all stacked heads in one ungridded pallas_call (~1 MiB VMEM)."""
    num_heads = W1.shape[0]
    b_pad = sa_pad.shape[0]
    out_pad = W3.shape[2]
    vmem_spec = pl.BlockSpec(memory_space=pltpu.MemorySpace.VMEM)
    return pl.pallas_call(
        _fused_heads_kernel,
        out_shape=jax.ShapeDtypeStruct((num_heads, b_pad, out_pad), jnp.float32),
        in_specs=[vmem_spec] * 6,
        out_specs=vmem_spec,
    )(sa_pad, W1, W2, B2, W3, B3)


# --------------------------- parameter creation ---------------------------- #
def _init_linear(key, in_dim, out_dim):
    """Deterministic small-scale init. Weight stored as (in, out), f32."""
    kw, kb = jax.random.split(key)
    bound = 1.0 / jnp.sqrt(jnp.float32(in_dim))
    w = jax.random.uniform(kw, (in_dim, out_dim), jnp.float32, -bound, bound)
    b = jax.random.uniform(kb, (1, out_dim), jnp.float32, -bound, bound)
    return w, b


def init_critic_params(key, state_dim, action_dim, discrete_ranges, hidden=HIDDEN):
    sa_dim = state_dim + action_dim
    keys = jax.random.split(key, 6 + 3 * len(discrete_ranges))
    params = {
        "l1": _init_linear(keys[0], sa_dim, hidden),
        "l2": _init_linear(keys[1], hidden, hidden),
        "l3": _init_linear(keys[2], hidden, 1),
        "l4": _init_linear(keys[3], sa_dim, hidden),
        "l5": _init_linear(keys[4], hidden, hidden),
        "l6": _init_linear(keys[5], hidden, 1),
        "discrete_q": {},
    }
    k = 6
    for name, num_actions in discrete_ranges.items():
        params["discrete_q"][name] = (
            _init_linear(keys[k + 0], sa_dim, hidden),
            _init_linear(keys[k + 1], hidden, hidden),
            _init_linear(keys[k + 2], hidden, num_actions),
        )
        k += 3
    return params


# ------------------ one-time stacking / padding (hoisted) ------------------- #
def prepare_critic_weights(params, discrete_ranges):
    """Build stacked, padded, bf16 weight slabs ONCE (off the forward hot path).

    Head order: [l1-l3, l4-l6, *discrete heads].  b1 is folded into an extra W1
    row (index sa_dim) paired with a ones column in `sa`.
    """
    heads = [
        (params["l1"], params["l2"], params["l3"]),
        (params["l4"], params["l5"], params["l6"]),
    ] + [params["discrete_q"][name] for name in discrete_ranges]

    sa_dim = heads[0][0][0].shape[0]
    in_pad = _round_up(sa_dim + 1, LANE)        # +1 guarantees a spare bias lane
    out_dims = [h[2][0].shape[1] for h in heads]
    out_pad = _round_up(max(out_dims), LANE)    # keep >= 128 for unmasked vst

    w1s, w2s, b2s, w3s, b3s = [], [], [], [], []
    for (w1, b1), (w2, b2), (w3, b3) in heads:
        in_dim, hidden = w1.shape
        assert in_dim == sa_dim, "all heads must share the sa input width"
        assert hidden == HIDDEN and w2.shape == (HIDDEN, HIDDEN), \
            "head hidden width must be HIDDEN"
        out_dim = w3.shape[1]
        w1p = jnp.zeros((in_pad, HIDDEN), jnp.float32)
        w1p = w1p.at[:in_dim, :].set(w1)
        w1p = w1p.at[in_dim, :].set(b1[0])      # fold b1 (pairs with ones column)
        w3p = jnp.zeros((HIDDEN, out_pad), jnp.float32).at[:, :out_dim].set(w3)
        b3p = jnp.zeros((1, out_pad), jnp.float32).at[:, :out_dim].set(b3)
        w1s.append(w1p)
        w2s.append(w2)
        b2s.append(b2)
        w3s.append(w3p)
        b3s.append(b3p)

    return {
        "W1": jnp.stack(w1s).astype(jnp.bfloat16),
        "W2": jnp.stack(w2s).astype(jnp.bfloat16),
        "B2": jnp.stack(b2s),
        "W3": jnp.stack(w3s).astype(jnp.bfloat16),
        "B3": jnp.stack(b3s),
        "sa_dim": sa_dim,
        "in_pad": in_pad,
        "out_pad": out_pad,
        "head_names": list(discrete_ranges.keys()),
        "out_dims": out_dims,
    }


def _build_sa(state, action, sa_dim, b_pad, in_pad):
    """Concatenate + zero-pad; set a ones column at sa_dim (folds b1 into W1)."""
    b, sd = state.shape
    ad = action.shape[1]
    assert sd + ad == sa_dim
    sa = jnp.zeros((b_pad, in_pad), jnp.float32)
    sa = sa.at[:b, :sd].set(state)
    sa = sa.at[:b, sd:sd + ad].set(action)
    sa = sa.at[:b, sa_dim].set(1.0)
    return sa.astype(jnp.bfloat16)


# ------------------------------ forward pass ------------------------------- #
def critic_forward(prepared, state, continuous_action):
    batch = state.shape[0]
    b_pad = _round_up(batch, SUBLANE)
    sa_pad = _build_sa(state, continuous_action,
                       prepared["sa_dim"], b_pad, prepared["in_pad"])
    out = fused_heads(sa_pad, prepared["W1"], prepared["W2"], prepared["B2"],
                      prepared["W3"], prepared["B3"])      # (H, b_pad, out_pad)
    q1_cont = out[0, :batch, :1]
    q2_cont = out[1, :batch, :1]
    discrete_q_values = {}
    for i, name in enumerate(prepared["head_names"]):
        discrete_q_values[name] = out[2 + i, :batch, :prepared["out_dims"][2 + i]]
    return q1_cont, q2_cont, discrete_q_values


def critic_q1(prepared, state, action):
    """Q1 path: run only head 0, sliced from the SAME prepared slabs so the
    bf16 math (padding, op order) is identical to critic_forward's head 0."""
    batch = state.shape[0]
    b_pad = _round_up(batch, SUBLANE)
    sa_pad = _build_sa(state, action, prepared["sa_dim"], b_pad, prepared["in_pad"])
    out = fused_heads(sa_pad,
                      prepared["W1"][:1], prepared["W2"][:1], prepared["B2"][:1],
                      prepared["W3"][:1], prepared["B3"][:1])
    return out[0, :batch, :1]


# ------------------------- pure-JAX f32 reference --------------------------- #
def _ref_head(sa, head):
    (w1, b1), (w2, b2), (w3, b3) = head
    h = jnp.maximum(sa @ w1 + b1, 0.0)
    h = jnp.maximum(h @ w2 + b2, 0.0)
    return h @ w3 + b3


# ---------------------------------- main ----------------------------------- #
if __name__ == "__main__":
    batch = 2
    state_dim = 16
    action_dim = 8
    discrete_ranges = {"gear": 5, "mode": 3}

    root = jax.random.PRNGKey(0)
    k_params, k_state, k_action = jax.random.split(root, 3)

    params = init_critic_params(k_params, state_dim, action_dim, discrete_ranges)
    prepared = prepare_critic_weights(params, discrete_ranges)   # hoisted, once

    state = jax.random.normal(k_state, (batch, state_dim), jnp.float32)
    continuous_action = jax.random.normal(k_action, (batch, action_dim), jnp.float32)

    q1, q2, disc = critic_forward(prepared, state, continuous_action)
    q1 = jax.block_until_ready(q1)
    q2 = jax.block_until_ready(q2)
    disc = {k: jax.block_until_ready(v) for k, v in disc.items()}

    # shape sanity checks (match PyTorch semantics)
    assert q1.shape == (batch, 1)
    assert q2.shape == (batch, 1)
    for name, num_actions in discrete_ranges.items():
        assert disc[name].shape == (batch, num_actions)

    # Q1 path reuses head 0 of the same prepared slabs -> same bf16 math
    q1_only = jax.block_until_ready(critic_q1(prepared, state, continuous_action))
    assert jnp.allclose(q1, q1_only, rtol=1e-6, atol=1e-6)

    # loose check against a pure-JAX f32 reference (bf16 matmul tolerance)
    sa = jnp.concatenate([state, continuous_action], axis=1)
    ref_q1 = _ref_head(sa, (params["l1"], params["l2"], params["l3"]))
    ref_q2 = _ref_head(sa, (params["l4"], params["l5"], params["l6"]))
    assert jnp.allclose(q1, ref_q1, rtol=1e-1, atol=1e-1)
    assert jnp.allclose(q2, ref_q2, rtol=1e-1, atol=1e-1)
    for name in discrete_ranges:
        ref_d = _ref_head(sa, params["discrete_q"][name])
        assert jnp.allclose(disc[name], ref_d, rtol=1e-1, atol=1e-1)

    print("KERNEL_OK")
</pallas_src>

<mosaic_0001>
module attributes {stable_mosaic.version = 11 : i64} {
  func.func @_fused_heads_kernel(%arg0: memref<16x128xbf16, #tpu.memory_space<vmem>>, %arg1: memref<4x128x256xbf16, #tpu.memory_space<vmem>>, %arg2: memref<4x256x256xbf16, #tpu.memory_space<vmem>>, %arg3: memref<4x1x256xf32, #tpu.memory_space<vmem>>, %arg4: memref<4x256x128xbf16, #tpu.memory_space<vmem>>, %arg5: memref<4x1x128xf32, #tpu.memory_space<vmem>>, %arg6: memref<4x16x128xf32, #tpu.memory_space<vmem>>) attributes {dimension_semantics = [], scalar_prefetch = 0 : i64, scratch_operands = 0 : i64, tpu.core_type = #tpu.core_type<tc>} {
    %c0 = arith.constant 0 : index
    %c0_0 = arith.constant 0 : index
    %0 = vector.load %arg0[%c0, %c0_0] : memref<16x128xbf16, #tpu.memory_space<vmem>>, vector<16x128xbf16>
    %c0_1 = arith.constant 0 : index
    %c0_2 = arith.constant 0 : index
    %c0_3 = arith.constant 0 : index
    %1 = vector.load %arg1[%c0_1, %c0_2, %c0_3] : memref<4x128x256xbf16, #tpu.memory_space<vmem>>, vector<1x128x256xbf16>
    %2 = vector.shape_cast %1 : vector<1x128x256xbf16> to vector<128x256xbf16>
    %cst = arith.constant dense<0.000000e+00> : vector<16x256xf32>
    %3 = tpu.matmul %0, %2, %cst {dimension_numbers = #tpu.dot_dimension_numbers<[1], [0], [0], [1], [0, 0, 1, 1], [], []>} : vector<16x128xbf16>, vector<128x256xbf16>, vector<16x256xf32> -> vector<16x256xf32>
    %cst_4 = arith.constant 0.000000e+00 : f32
    %4 = vector.broadcast %cst_4 : f32 to vector<16x256xf32>
    %5 = arith.maximumf %3, %4 : vector<16x256xf32>
    %6 = arith.truncf %5 : vector<16x256xf32> to vector<16x256xbf16>
    %c0_5 = arith.constant 0 : index
    %c0_6 = arith.constant 0 : index
    %c0_7 = arith.constant 0 : index
    %7 = vector.load %arg2[%c0_5, %c0_6, %c0_7] : memref<4x256x256xbf16, #tpu.memory_space<vmem>>, vector<1x256x256xbf16>
    %8 = vector.shape_cast %7 : vector<1x256x256xbf16> to vector<256x256xbf16>
    %cst_8 = arith.constant dense<0.000000e+00> : vector<16x256xf32>
    %9 = tpu.matmul %6, %8, %cst_8 {dimension_numbers = #tpu.dot_dimension_numbers<[1], [0], [0], [1], [0, 0, 1, 1], [], []>} : vector<16x256xbf16>, vector<256x256xbf16>, vector<16x256xf32> -> vector<16x256xf32>
    %c0_9 = arith.constant 0 : index
    %c0_10 = arith.constant 0 : index
    %c0_11 = arith.constant 0 : index
    %10 = vector.load %arg3[%c0_9, %c0_10, %c0_11] : memref<4x1x256xf32, #tpu.memory_space<vmem>>, vector<1x1x256xf32>
    %11 = vector.shape_cast %10 : vector<1x1x256xf32> to vector<1x256xf32>
    %12 = vector.broadcast %11 : vector<1x256xf32> to vector<16x256xf32>
    %13 = arith.addf %9, %12 : vector<16x256xf32>
    %cst_12 = arith.constant 0.000000e+00 : f32
    %14 = vector.broadcast %cst_12 : f32 to vector<16x256xf32>
    %15 = arith.maximumf %13, %14 : vector<16x256xf32>
    %16 = arith.truncf %15 : vector<16x256xf32> to vector<16x256xbf16>
    %c0_13 = arith.constant 0 : index
    %c0_14 = arith.constant 0 : index
    %c0_15 = arith.constant 0 : index
    %17 = vector.load %arg4[%c0_13, %c0_14, %c0_15] : memref<4x256x128xbf16, #tpu.memory_space<vmem>>, vector<1x256x128xbf16>
    %18 = vector.shape_cast %17 : vector<1x256x128xbf16> to vector<256x128xbf16>
    %cst_16 = arith.constant dense<0.000000e+00> : vector<16x128xf32>
    %19 = tpu.matmul %16, %18, %cst_16 {dimension_numbers = #tpu.dot_dimension_numbers<[1], [0], [0], [1], [0, 0, 1, 1], [], []>} : vector<16x256xbf16>, vector<256x128xbf16>, vector<16x128xf32> -> vector<16x128xf32>
    %c0_17 = arith.constant 0 : index
    %c0_18 = arith.constant 0 : index
    %c0_19 = arith.constant 0 : index
    %20 = vector.load %arg5[%c0_17, %c0_18, %c0_19] : memref<4x1x128xf32, #tpu.memory_space<vmem>>, vector<1x1x128xf32>
    %21 = vector.shape_cast %20 : vector<1x1x128xf32> to vector<1x128xf32>
    %22 = vector.broadcast %21 : vector<1x128xf32> to vector<16x128xf32>
    %23 = arith.addf %19, %22 : vector<16x128xf32>
    %c0_20 = arith.constant 0 : index
    %c0_21 = arith.constant 0 : index
    %c0_22 = arith.constant 0 : index
    %24 = vector.load %arg6[%c0_20, %c0_21, %c0_22] : memref<4x16x128xf32, #tpu.memory_space<vmem>>, vector<1x16x128xf32>
    %25 = vector.shape_cast %24 : vector<1x16x128xf32> to vector<16x128xf32>
    %26 = vector.shape_cast %23 : vector<16x128xf32> to vector<1x16x128xf32>
    tpu.vector_store %arg6[%c0_20, %c0_21, %c0_22], %26 {strides = array<i32>} : memref<4x16x128xf32, #tpu.memory_space<vmem>>, vector<1x16x128xf32>,
    %c1 = arith.constant 1 : index
    %c0_23 = arith.constant 0 : index
    %c0_24 = arith.constant 0 : index
    %27 = vector.load %arg1[%c1, %c0_23, %c0_24] : memref<4x128x256xbf16, #tpu.memory_space<vmem>>, vector<1x128x256xbf16>
    %28 = vector.shape_cast %27 : vector<1x128x256xbf16> to vector<128x256xbf16>
    %cst_25 = arith.constant dense<0.000000e+00> : vector<16x256xf32>
    %29 = tpu.matmul %0, %28, %cst_25 {dimension_numbers = #tpu.dot_dimension_numbers<[1], [0], [0], [1], [0, 0, 1, 1], [], []>} : vector<16x128xbf16>, vector<128x256xbf16>, vector<16x256xf32> -> vector<16x256xf32>
    %cst_26 = arith.constant 0.000000e+00 : f32
    %30 = vector.broadcast %cst_26 : f32 to vector<16x256xf32>
    %31 = arith.maximumf %29, %30 : vector<16x256xf32>
    %32 = arith.truncf %31 : vector<16x256xf32> to vector<16x256xbf16>
    %c1_27 = arith.constant 1 : index
    %c0_28 = arith.constant 0 : index
    %c0_29 = arith.constant 0 : index
    %33 = vector.load %arg2[%c1_27, %c0_28, %c0_29] : memref<4x256x256xbf16, #tpu.memory_space<vmem>>, vector<1x256x256xbf16>
    %34 = vector.shape_cast %33 : vector<1x256x256xbf16> to vector<256x256xbf16>
    %cst_30 = arith.constant dense<0.000000e+00> : vector<16x256xf32>
    %35 = tpu.matmul %32, %34, %cst_30 {dimension_numbers = #tpu.dot_dimension_numbers<[1], [0], [0], [1], [0, 0, 1, 1], [], []>} : vector<16x256xbf16>, vector<256x256xbf16>, vector<16x256xf32> -> vector<16x256xf32>
    %c1_31 = arith.constant 1 : index
    %c0_32 = arith.constant 0 : index
    %c0_33 = arith.constant 0 : index
    %36 = vector.load %arg3[%c1_31, %c0_32, %c0_33] : memref<4x1x256xf32, #tpu.memory_space<vmem>>, vector<1x1x256xf32>
    %37 = vector.shape_cast %36 : vector<1x1x256xf32> to vector<1x256xf32>
    %38 = vector.broadcast %37 : vector<1x256xf32> to vector<16x256xf32>
    %39 = arith.addf %35, %38 : vector<16x256xf32>
    %cst_34 = arith.constant 0.000000e+00 : f32
    %40 = vector.broadcast %cst_34 : f32 to vector<16x256xf32>
    %41 = arith.maximumf %39, %40 : vector<16x256xf32>
    %42 = arith.truncf %41 : vector<16x256xf32> to vector<16x256xbf16>
    %c1_35 = arith.constant 1 : index
    %c0_36 = arith.constant 0 : index
    %c0_37 = arith.constant 0 : index
    %43 = vector.load %arg4[%c1_35, %c0_36, %c0_37] : memref<4x256x128xbf16, #tpu.memory_space<vmem>>, vector<1x256x128xbf16>
    %44 = vector.shape_cast %43 : vector<1x256x128xbf16> to vector<256x128xbf16>
    %cst_38 = arith.constant dense<0.000000e+00> : vector<16x128xf32>
    %45 = tpu.matmul %42, %44, %cst_38 {dimension_numbers = #tpu.dot_dimension_numbers<[1], [0], [0], [1], [0, 0, 1, 1], [], []>} : vector<16x256xbf16>, vector<256x128xbf16>, vector<16x128xf32> -> vector<16x128xf32>
    %c1_39 = arith.constant 1 : index
    %c0_40 = arith.constant 0 : index
    %c0_41 = arith.constant 0 : index
    %46 = vector.load %arg5[%c1_39, %c0_40, %c0_41] : memref<4x1x128xf32, #tpu.memory_space<vmem>>, vector<1x1x128xf32>
    %47 = vector.shape_cast %46 : vector<1x1x128xf32> to vector<1x128xf32>
    %48 = vector.broadcast %47 : vector<1x128xf32> to vector<16x128xf32>
    %49 = arith.addf %45, %48 : vector<16x128xf32>
    %c1_42 = arith.constant 1 : index
    %c0_43 = arith.constant 0 : index
    %c0_44 = arith.constant 0 : index
    %50 = vector.load %arg6[%c1_42, %c0_43, %c0_44] : memref<4x16x128xf32, #tpu.memory_space<vmem>>, vector<1x16x128xf32>
    %51 = vector.shape_cast %50 : vector<1x16x128xf32> to vector<16x128xf32>
    %52 = vector.shape_cast %49 : vector<16x128xf32> to vector<1x16x128xf32>
    tpu.vector_store %arg6[%c1_42, %c0_43, %c0_44], %52 {strides = array<i32>} : memref<4x16x128xf32, #tpu.memory_space<vmem>>, vector<1x16x128xf32>,
    %c2 = arith.constant 2 : index
    %c0_45 = arith.constant 0 : index
    %c0_46 = arith.constant 0 : index
    %53 = vector.load %arg1[%c2, %c0_45, %c0_46] : memref<4x128x256xbf16, #tpu.memory_space<vmem>>, vector<1x128x256xbf16>
    %54 = vector.shape_cast %53 : vector<1x128x256xbf16> to vector<128x256xbf16>
    %cst_47 = arith.constant dense<0.000000e+00> : vector<16x256xf32>
    %55 = tpu.matmul %0, %54, %cst_47 {dimension_numbers = #tpu.dot_dimension_numbers<[1], [0], [0], [1], [0, 0, 1, 1], [], []>} : vector<16x128xbf16>, vector<128x256xbf16>, vector<16x256xf32> -> vector<16x256xf32>
    %cst_48 = arith.constant 0.000000e+00 : f32
    %56 = vector.broadcast %cst_48 : f32 to vector<16x256xf32>
    %57 = arith.maximumf %55, %56 : vector<16x256xf32>
    %58 = arith.truncf %57 : vector<16x256xf32> to vector<16x256xbf16>
    %c2_49 = arith.constant 2 : index
    %c0_50 = arith.constant 0 : index
    %c0_51 = arith.constant 0 : index
    %59 = vector.load %arg2[%c2_49, %c0_50, %c0_51] : memref<4x256x256xbf16, #tpu.memory_space<vmem>>, vector<1x256x256xbf16>
    %60 = vector.shape_cast %59 : vector<1x256x256xbf16> to vector<256x256xbf16>
    %cst_52 = arith.constant dense<0.000000e+00> : vector<16x256xf32>
    %61 = tpu.matmul %58, %60, %cst_52 {dimension_numbers = #tpu.dot_dimension_numbers<[1], [0], [0], [1], [0, 0, 1, 1], [], []>} : vector<16x256xbf16>, vector<256x256xbf16>, vector<16x256xf32> -> vector<16x256xf32>
    %c2_53 = arith.constant 2 : index
    %c0_54 = arith.constant 0 : index
    %c0_55 = arith.constant 0 : index
    %62 = vector.load %arg3[%c2_53, %c0_54, %c0_55] : memref<4x1x256xf32, #tpu.memory_space<vmem>>, vector<1x1x256xf32>
    %63 = vector.shape_cast %62 : vector<1x1x256xf32> to vector<1x256xf32>
    %64 = vector.broadcast %63 : vector<1x256xf32> to vector<16x256xf32>
    %65 = arith.addf %61, %64 : vector<16x256xf32>
    %cst_56 = arith.constant 0.000000e+00 : f32
    %66 = vector.broadcast %cst_56 : f32 to vector<16x256xf32>
    %67 = arith.maximumf %65, %66 : vector<16x256xf32>
    %68 = arith.truncf %67 : vector<16x256xf32> to vector<16x256xbf16>
    %c2_57 = arith.constant 2 : index
    %c0_58 = arith.constant 0 : index
    %c0_59 = arith.constant 0 : index
    %69 = vector.load %arg4[%c2_57, %c0_58, %c0_59] : memref<4x256x128xbf16, #tpu.memory_space<vmem>>, vector<1x256x128xbf16>
    %70 = vector.shape_cast %69 : vector<1x256x128xbf16> to vector<256x128xbf16>
    %cst_60 = arith.constant dense<0.000000e+00> : vector<16x128xf32>
    %71 = tpu.matmul %68, %70, %cst_60 {dimension_numbers = #tpu.dot_dimension_numbers<[1], [0], [0], [1], [0, 0, 1, 1], [], []>} : vector<16x256xbf16>, vector<256x128xbf16>, vector<16x128xf32> -> vector<16x128xf32>
    %c2_61 = arith.constant 2 : index
    %c0_62 = arith.constant 0 : index
    %c0_63 = arith.constant 0 : index
    %72 = vector.load %arg5[%c2_61, %c0_62, %c0_63] : memref<4x1x128xf32, #tpu.memory_space<vmem>>, vector<1x1x128xf32>
    %73 = vector.shape_cast %72 : vector<1x1x128xf32> to vector<1x128xf32>
    %74 = vector.broadcast %73 : vector<1x128xf32> to vector<16x128xf32>
    %75 = arith.addf %71, %74 : vector<16x128xf32>
    %c2_64 = arith.constant 2 : index
    %c0_65 = arith.constant 0 : index
    %c0_66 = arith.constant 0 : index
    %76 = vector.load %arg6[%c2_64, %c0_65, %c0_66] : memref<4x16x128xf32, #tpu.memory_space<vmem>>, vector<1x16x128xf32>
    %77 = vector.shape_cast %76 : vector<1x16x128xf32> to vector<16x128xf32>
    %78 = vector.shape_cast %75 : vector<16x128xf32> to vector<1x16x128xf32>
    tpu.vector_store %arg6[%c2_64, %c0_65, %c0_66], %78 {strides = array<i32>} : memref<4x16x128xf32, #tpu.memory_space<vmem>>, vector<1x16x128xf32>,
    %c3 = arith.constant 3 : index
    %c0_67 = arith.constant 0 : index
    %c0_68 = arith.constant 0 : index
    %79 = vector.load %arg1[%c3, %c0_67, %c0_68] : memref<4x128x256xbf16, #tpu.memory_space<vmem>>, vector<1x128x256xbf16>
    %80 = vector.shape_cast %79 : vector<1x128x256xbf16> to vector<128x256xbf16>
    %cst_69 = arith.constant dense<0.000000e+00> : vector<16x256xf32>
    %81 = tpu.matmul %0, %80, %cst_69 {dimension_numbers = #tpu.dot_dimension_numbers<[1], [0], [0], [1], [0, 0, 1, 1], [], []>} : vector<16x128xbf16>, vector<128x256xbf16>, vector<16x256xf32> -> vector<16x256xf32>
    %cst_70 = arith.constant 0.000000e+00 : f32
    %82 = vector.broadcast %cst_70 : f32 to vector<16x256xf32>
    %83 = arith.maximumf %81, %82 : vector<16x256xf32>
    %84 = arith.truncf %83 : vector<16x256xf32> to vector<16x256xbf16>
    %c3_71 = arith.constant 3 : index
    %c0_72 = arith.constant 0 : index
    %c0_73 = arith.constant 0 : index
    %85 = vector.load %arg2[%c3_71, %c0_72, %c0_73] : memref<4x256x256xbf16, #tpu.memory_space<vmem>>, vector<1x256x256xbf16>
    %86 = vector.shape_cast %85 : vector<1x256x256xbf16> to vector<256x256xbf16>
    %cst_74 = arith.constant dense<0.000000e+00> : vector<16x256xf32>
    %87 = tpu.matmul %84, %86, %cst_74 {dimension_numbers = #tpu.dot_dimension_numbers<[1], [0], [0], [1], [0, 0, 1, 1], [], []>} : vector<16x256xbf16>, vector<256x256xbf16>, vector<16x256xf32> -> vector<16x256xf32>
    %c3_75 = arith.constant 3 : index
    %c0_76 = arith.constant 0 : index
    %c0_77 = arith.constant 0 : index
    %88 = vector.load %arg3[%c3_75, %c0_76, %c0_77] : memref<4x1x256xf32, #tpu.memory_space<vmem>>, vector<1x1x256xf32>
    %89 = vector.shape_cast %88 : vector<1x1x256xf32> to vector<1x256xf32>
    %90 = vector.broadcast %89 : vector<1x256xf32> to vector<16x256xf32>
    %91 = arith.addf %87, %90 : vector<16x256xf32>
    %cst_78 = arith.constant 0.000000e+00 : f32
    %92 = vector.broadcast %cst_78 : f32 to vector<16x256xf32>
    %93 = arith.maximumf %91, %92 : vector<16x256xf32>
    %94 = arith.truncf %93 : vector<16x256xf32> to vector<16x256xbf16>
    %c3_79 = arith.constant 3 : index
    %c0_80 = arith.constant 0 : index
    %c0_81 = arith.constant 0 : index
    %95 = vector.load %arg4[%c3_79, %c0_80, %c0_81] : memref<4x256x128xbf16, #tpu.memory_space<vmem>>, vector<1x256x128xbf16>
    %96 = vector.shape_cast %95 : vector<1x256x128xbf16> to vector<256x128xbf16>
    %cst_82 = arith.constant dense<0.000000e+00> : vector<16x128xf32>
    %97 = tpu.matmul %94, %96, %cst_82 {dimension_numbers = #tpu.dot_dimension_numbers<[1], [0], [0], [1], [0, 0, 1, 1], [], []>} : vector<16x256xbf16>, vector<256x128xbf16>, vector<16x128xf32> -> vector<16x128xf32>
    %c3_83 = arith.constant 3 : index
    %c0_84 = arith.constant 0 : index
    %c0_85 = arith.constant 0 : index
    %98 = vector.load %arg5[%c3_83, %c0_84, %c0_85] : memref<4x1x128xf32, #tpu.memory_space<vmem>>, vector<1x1x128xf32>
    %99 = vector.shape_cast %98 : vector<1x1x128xf32> to vector<1x128xf32>
    %100 = vector.broadcast %99 : vector<1x128xf32> to vector<16x128xf32>
    %101 = arith.addf %97, %100 : vector<16x128xf32>
    %c3_86 = arith.constant 3 : index
    %c0_87 = arith.constant 0 : index
    %c0_88 = arith.constant 0 : index
    %102 = vector.load %arg6[%c3_86, %c0_87, %c0_88] : memref<4x16x128xf32, #tpu.memory_space<vmem>>, vector<1x16x128xf32>
    %103 = vector.shape_cast %102 : vector<1x16x128xf32> to vector<16x128xf32>
    %104 = vector.shape_cast %101 : vector<16x128xf32> to vector<1x16x128xf32>
    tpu.vector_store %arg6[%c3_86, %c0_87, %c0_88], %104 {strides = array<i32>} : memref<4x16x128xf32, #tpu.memory_space<vmem>>, vector<1x16x128xf32>,
    return
  }
}

</mosaic_0001>

<bundles_post_ra>
// kernel: tpu_custom_call.1
= control target key start
LH: loop header
LB: loop body
LE: loop exit
PB: predicated region body
PF: predicated region fallthrough
CT: control target
= control target key end

     0   :  { %11 = vsyncpa [#allocation3], 0  ;;  %s3441_s0 = inlined_call_operand.hbm [shape: bf16[16,128], index: 0, kind: input, shape index: {}]   ;;  %s3442_s1 = inlined_call_operand.hbm [shape: bf16[4,128,256], index: 1, kind: input, shape index: {}]   ;;  %s3443_s2 = inlined_call_operand.hbm [shape: bf16[4,256,256], index: 2, kind: input, shape index: {}]   ;;  %s3444_s3 = inlined_call_operand.vmem [shape: f32[4,1,256], index: 3, kind: input, shape index: {}]   ;;  %s3445_s4 = inlined_call_operand.hbm [shape: bf16[4,256,128], index: 4, kind: input, shape index: {}]   ;;  %s3446_s5 = inlined_call_operand.vmem [shape: f32[4,1,128], index: 5, kind: input, shape index: {}]   ;;  %s3447_s6 = inlined_call_operand.hbm [shape: f32[4,16,128], index: 6, kind: output, shape index: {}]  }
   0x1   :  { %12 = vsyncpa [#allocation6], 0 }
   0x2   :  { %13 = vsyncpa [#allocation9], 0 }
   0x3   :  { %14 = vsyncpa [#allocation4], 0  ;;  %s3266_s21 = smov [#allocation5]   ;;  %s3148_s25 = scalar_lea.hbm %s3442_s1, 8192 }
   0x4   :  { %s32_s22 = sshll.u32 %s3266_s21, 4  ;;  %p3149_p0 = scmp.ne.s32.totalorder %s3442_s1, %s3148_s25  ;;  %s33_s22 = int_to_ptr.vmem [resolvable:$true] %s32_s22 }
   0x5   :  { %p3152_p1 = scmp.lt.u32.totalorder %s3148_s25, %s3442_s1 }
   0x7   :  { %p3154_p2 = pnand %p3152_p1, %p3149_p0 }
   0x9   :  { %3157 = shalt.err (!%p3154_p2)
}
   0xa   :  { %s3158_s30 = scalar_lea.vmem %s33_s22, 8192  ;;  %p3163_p4 = scmp.lt.s32.totalorder %s33_s22, %s33_s22 }
   0xb   :  { %p3159_p3 = scmp.ne.s32.totalorder %s33_s22, %s3158_s30  ;;  %p3164_p5 = scmp.lt.s32.totalorder %s3158_s30, %s3158_s30 }
   0xd   :  { %p3165_p6 = por %p3164_p5, %p3163_p4 }
   0xf   :  { %p3166_p7 = pnand %p3165_p6, %p3159_p3 }
  0x11   :  { %3169 = shalt.err (!%p3166_p7)
}
  0x12   :  { %s3267_s7 = smov 128   ;;  %s3268_s8 = smov 8  }
  0x13   :  { %38 = dma.hbm_to_vmem [thread:$0]  %s3442_s1, 8192, %s33_s22, [#allocation6], %s3267_s7, %s3267_s7, %s3268_s8  }
  0x14   :  { %s3269_s11 = smov [#allocation2]   ;;  %s3170_s15 = scalar_lea.hbm %s3441_s0, 128 }
  0x15   :  { %s20_s12 = sshll.u32 %s3269_s11, 4  ;;  %p3171_p8 = scmp.ne.s32.totalorder %s3441_s0, %s3170_s15  ;;  %s21_s12 = int_to_ptr.vmem [resolvable:$true] %s20_s12 }
  0x16   :  { %p3174_p9 = scmp.lt.u32.totalorder %s3170_s15, %s3441_s0 }
  0x18   :  { %p3176_p10 = pnand %p3174_p9, %p3171_p8 }
  0x1a   :  { %3179 = shalt.err (!%p3176_p10)
}
  0x1b   :  { %s3180_s20 = scalar_lea.vmem %s21_s12, 128  ;;  %p3185_p12 = scmp.lt.s32.totalorder %s21_s12, %s21_s12 }
  0x1c   :  { %p3181_p11 = scmp.ne.s32.totalorder %s21_s12, %s3180_s20  ;;  %p3186_p13 = scmp.lt.s32.totalorder %s3180_s20, %s3180_s20 }
  0x1e   :  { %p3187_p0 = por %p3186_p13, %p3185_p12 }
  0x20   :  { %p3188_p1 = pnand %p3187_p0, %p3181_p11 }
  0x22   :  { %3191 = shalt.err (!%p3188_p1)
}
  0x23   :  { %s3270_s1 = smov 64   ;;  %s3271_s21 = smov 4  }
  0x24   :  { %26 = dma.hbm_to_vmem [thread:$0]  %s3441_s0, 128, %s21_s12, [#allocation3], %s3270_s1, %s3270_s1, %s3271_s21  }
  0x25   :  { %s3272_s24 = smov [#allocation7]   ;;  %s3273_s26 = smov [#allocation8]  }
  0x26   :  { %s44_s25 = sshll.u32 %s3272_s24, 4  ;;  %s58_s27 = sshll.u32 %s3273_s26, 4  ;;  %s45_s25 = int_to_ptr.vmem [resolvable:$true] %s44_s25  ;;  %s3341_s27 = int_to_ptr.vmem [resolvable:$true] %s58_s27 }
  0x27   :  { %s3192_s30 = scalar_lea.hbm %s3443_s2, 16384 }
  0x28   :  { %p3193_p2 = scmp.ne.s32.totalorder %s3443_s2, %s3192_s30  ;;  %p3196_p3 = scmp.lt.u32.totalorder %s3192_s30, %s3443_s2 }
  0x2a   :  { %p3198_p4 = pnand %p3196_p3, %p3193_p2 }
  0x2c   :  { %3201 = shalt.err (!%p3198_p4)
}
  0x2d   :  { %s3202_s0 = scalar_lea.vmem %s45_s25, 16384  ;;  %p3207_p6 = scmp.lt.s32.totalorder %s45_s25, %s45_s25 }
  0x2e   :  { %p3203_p5 = scmp.ne.s32.totalorder %s45_s25, %s3202_s0  ;;  %p3208_p7 = scmp.lt.s32.totalorder %s3202_s0, %s3202_s0 }
  0x30   :  { %p3209_p8 = por %p3208_p7, %p3207_p6 }
  0x32   :  { %p3210_p9 = pnand %p3209_p8, %p3203_p5 }
  0x34   :  { %3213 = shalt.err (!%p3210_p9)
}
  0x35   :  { %50 = dma.hbm_to_vmem [thread:$0]  %s3443_s2, 16384, %s45_s25, [#allocation6], %s3267_s7, %s3267_s7, %s3268_s8  }
  0x36   :  { %s3214_s17 = scalar_lea.hbm %s3445_s4, 8192 }
  0x37   :  { %p3215_p10 = scmp.ne.s32.totalorder %s3445_s4, %s3214_s17  ;;  %p3218_p11 = scmp.lt.u32.totalorder %s3214_s17, %s3445_s4 }
  0x39   :  { %p3220_p12 = pnand %p3218_p11, %p3215_p10 }
  0x3b   :  { %3223 = shalt.err (!%p3220_p12)
}
  0x3c   :  { %s3224_s23 = scalar_lea.vmem %s3341_s27, 8192  ;;  %p3229_p0 = scmp.lt.s32.totalorder %s3341_s27, %s3341_s27 }
  0x3d   :  { %p3225_p13 = scmp.ne.s32.totalorder %s3341_s27, %s3224_s23  ;;  %p3230_p1 = scmp.lt.s32.totalorder %s3224_s23, %s3224_s23 }
  0x3f   :  { %p3231_p2 = por %p3230_p1, %p3229_p0 }
  0x41   :  { %p3232_p3 = pnand %p3231_p2, %p3225_p13 }
  0x43   :  { %3235 = shalt.err (!%p3232_p3)
}
  0x44   :  { %64 = dma.hbm_to_vmem [thread:$0]  %s3445_s4, 8192, %s3341_s27, [#allocation9], %s3270_s1, %s3270_s1, %s3271_s21  }
  0x45   :  { %3258 = dma.done.wait [#allocation3], 128  }
  0x46   :  { %3259 = vsyncadd [#allocation3], 4294967168 }
  0x47   :  { %3260 = dma.done.wait [#allocation6], 24576  }
  0x48   :  { %3261 = vsyncadd [#allocation6], 4294942720 }
  0x49   :  { %3262 = dma.done.wait [#allocation9], 8192  }
  0x4a   :  { %3263 = vsyncadd [#allocation9], 4294959104  ;;  %v3274_v0 = vmov 0   ;;  %v2794_v1 = vld [vmem:[#allocation5 + $0x4] ss:$8 sps:$4 sm:$0xff]   ;;  %v3379_v27 = vld [vmem:[#allocation2] sm:$0xff]  }
  0x4b   :  { %216 = vmatprep.mubr.bf16.mxu0 %v3274_v0  ;;  %v2796_v2 = vld [vmem:[#allocation5] ss:$8 sps:$4 sm:$0xff]   ;;  %184 = vmatprep.subr.bf16.mxu0 %v2794_v1  ;;  %v2797_v3 = vld [vmem:[#allocation5 + $0x14] ss:$8 sps:$4 sm:$0xff]   ;;  %v2799_v4 = vld [vmem:[#allocation5 + $0x10] ss:$8 sps:$4 sm:$0xff]  }
  0x4c   :  { %185 = vmatpush1.bf16.msra.mxu0 %v2796_v2  ;;  %v2800_v5 = vld [vmem:[#allocation5 + $0x24] ss:$8 sps:$4 sm:$0xff]   ;;  %v2802_v6 = vld [vmem:[#allocation5 + $0x20] ss:$8 sps:$4 sm:$0xff]   ;;  %v2803_v7 = vld [vmem:[#allocation5 + $0x34] ss:$8 sps:$4 sm:$0xff]  }
  0x4d   :  { %186 = vmatprep.subr.bf16.mxu0 %v2797_v3  ;;  %v2805_v8 = vld [vmem:[#allocation5 + $0x30] ss:$8 sps:$4 sm:$0xff]   ;;  %v2806_v9 = vld [vmem:[#allocation5 + $0x44] ss:$8 sps:$4 sm:$0xff]   ;;  %v2821_v11 = vld [vmem:[#allocation7] ss:$8 sps:$4 sm:$0xff]  }
  0x4e   :  { %v2819_v10 = vld [vmem:[#allocation7 + $0x4] ss:$8 sps:$4 sm:$0xff]   ;;  %v2822_v12 = vld [vmem:[#allocation7 + $0x14] ss:$8 sps:$4 sm:$0xff]   ;;  %v2808_v13 = vld [vmem:[#allocation5 + $0x40] ss:$8 sps:$4 sm:$0xff]  }
  0x4f   :  { %437 = vmatprep.subr.bf16.mxu1 %v2819_v10  ;;  %v2824_v14 = vld [vmem:[#allocation7 + $0x10] ss:$8 sps:$4 sm:$0xff]   ;;  %v2809_v15 = vld [vmem:[#allocation5 + $0x54] ss:$8 sps:$4 sm:$0xff]   ;;  %v2825_v16 = vld [vmem:[#allocation7 + $0x24] ss:$8 sps:$4 sm:$0xff]  }
  0x50   :  { %187 = vmatpush1.bf16.msra.mxu0 %v2799_v4  ;;  %438 = vmatpush1.bf16.msra.mxu1 %v2821_v11  ;;  %v2811_v17 = vld [vmem:[#allocation5 + $0x50] ss:$8 sps:$4 sm:$0xff]   ;;  %v2827_v18 = vld [vmem:[#allocation7 + $0x20] ss:$8 sps:$4 sm:$0xff]   ;;  %v2812_v19 = vld [vmem:[#allocation5 + $0x64] ss:$8 sps:$4 sm:$0xff]  }
  0x51   :  { %188 = vmatprep.subr.bf16.mxu0 %v2800_v5  ;;  %439 = vmatprep.subr.bf16.mxu1 %v2822_v12  ;;  %v2828_v20 = vld [vmem:[#allocation7 + $0x34] ss:$8 sps:$4 sm:$0xff]   ;;  %v2814_v21 = vld [vmem:[#allocation5 + $0x60] ss:$8 sps:$4 sm:$0xff]   ;;  %v2830_v22 = vld [vmem:[#allocation7 + $0x30] ss:$8 sps:$4 sm:$0xff]  }
  0x52   :  { %v2815_v23 = vld [vmem:[#allocation5 + $0x74] ss:$8 sps:$4 sm:$0xff]   ;;  %v2831_v24 = vld [vmem:[#allocation7 + $0x44] ss:$8 sps:$4 sm:$0xff]   ;;  %v2817_v25 = vld [vmem:[#allocation5 + $0x70] ss:$8 sps:$4 sm:$0xff]  }
  0x53   :  { %v2833_v26 = vld [vmem:[#allocation7 + $0x40] ss:$8 sps:$4 sm:$0xff]   ;;  %v2834_v28 = vld [vmem:[#allocation7 + $0x54] ss:$8 sps:$4 sm:$0xff]   ;;  %v2836_v29 = vld [vmem:[#allocation7 + $0x50] ss:$8 sps:$4 sm:$0xff]  }
  0x54   :  { %189 = vmatpush1.bf16.msra.mxu0 %v2802_v6  ;;  %440 = vmatpush1.bf16.msra.mxu1 %v2824_v14  ;;  %v2837_v30 = vld [vmem:[#allocation7 + $0x64] ss:$8 sps:$4 sm:$0xff]   ;;  %v2839_v31 = vld [vmem:[#allocation7 + $0x60] ss:$8 sps:$4 sm:$0xff]   ;;  %v2840_v32 = vld [vmem:[#allocation7 + $0x74] ss:$8 sps:$4 sm:$0xff]  }
  0x55   :  { %190 = vmatprep.subr.bf16.mxu0 %v2803_v7  ;;  %441 = vmatprep.subr.bf16.mxu1 %v2825_v16  ;;  %v2842_v33 = vld [vmem:[#allocation7 + $0x70] ss:$8 sps:$4 sm:$0xff]   ;;  %v2843_v34 = vld [vmem:[#allocation7 + $0x84] ss:$8 sps:$4 sm:$0xff]   ;;  %v2845_v35 = vld [vmem:[#allocation7 + $0x80] ss:$8 sps:$4 sm:$0xff]  }
  0x56   :  { %v2846_v36 = vld [vmem:[#allocation7 + $0x94] ss:$8 sps:$4 sm:$0xff]   ;;  %v2848_v37 = vld [vmem:[#allocation7 + $0x90] ss:$8 sps:$4 sm:$0xff]   ;;  %v2849_v38 = vld [vmem:[#allocation7 + $0xa4] ss:$8 sps:$4 sm:$0xff]  }
  0x57   :  { %v2851_v39 = vld [vmem:[#allocation7 + $0xa0] ss:$8 sps:$4 sm:$0xff]   ;;  %v2852_v40 = vld [vmem:[#allocation7 + $0xb4] ss:$8 sps:$4 sm:$0xff]   ;;  %v2854_v41 = vld [vmem:[#allocation7 + $0xb0] ss:$8 sps:$4 sm:$0xff]  }
  0x58   :  { %191 = vmatpush1.bf16.msra.mxu0 %v2805_v8  ;;  %442 = vmatpush1.bf16.msra.mxu1 %v2827_v18  ;;  %v2855_v42 = vld [vmem:[#allocation7 + $0xc4] ss:$8 sps:$4 sm:$0xff]   ;;  %v2857_v43 = vld [vmem:[#allocation7 + $0xc0] ss:$8 sps:$4 sm:$0xff]   ;;  %v2858_v44 = vld [vmem:[#allocation7 + $0xd4] ss:$8 sps:$4 sm:$0xff]  }
  0x59   :  { %192 = vmatprep.subr.bf16.mxu0 %v2806_v9  ;;  %443 = vmatprep.subr.bf16.mxu1 %v2828_v20  ;;  %v2860_v45 = vld [vmem:[#allocation7 + $0xd0] ss:$8 sps:$4 sm:$0xff]   ;;  %v2861_v46 = vld [vmem:[#allocation7 + $0xe4] ss:$8 sps:$4 sm:$0xff]   ;;  %v2863_v47 = vld [vmem:[#allocation7 + $0xe0] ss:$8 sps:$4 sm:$0xff]  }
  0x5a   :  { %v2864_v48 = vld [vmem:[#allocation7 + $0xf4] ss:$8 sps:$4 sm:$0xff]   ;;  %v2866_v49 = vld [vmem:[#allocation7 + $0xf0] ss:$8 sps:$4 sm:$0xff]   ;;  %v2867_v50 = vld [vmem:[#allocation8 + $0x40] sm:$0xff]   ;;  %s3275_s14 = smov [#allocation10]  }
  0x5b   :  { %v2868_v51 = vld [vmem:[#allocation8] sm:$0xff]   ;;  %v2869_v52 = vld [vmem:[#allocation8 + $0x48] sm:$0xff]   ;;  %v2871_v54 = vld [vmem:[#allocation8 + $0x50] sm:$0xff]   ;;  %s2415_s15 = sshll.u32 %s3275_s14, 4  ;;  %s2416_s15 = int_to_ptr.vmem [resolvable:$true] %s2415_s15 }
  0x5c   :  { %193 = vmatpush1.bf16.msra.mxu0 %v2808_v13  ;;  %444 = vmatpush1.bf16.msra.mxu1 %v2830_v22  ;;  %v2870_v53 = vld [vmem:[#allocation8 + $0x8] sm:$0xff]   ;;  %v2872_v55 = vld [vmem:[#allocation8 + $0x10] sm:$0xff]   ;;  %v2873_v56 = vld [vmem:[#allocation8 + $0x58] sm:$0xff]   ;;  %s3236_s16 = scalar_lea.vmem %s2416_s15, 1024  ;;  %p3241_p5 = scmp.lt.s32.totalorder %s2416_s15, %s2416_s15 }
  0x5d   :  { %194 = vmatprep.subr.bf16.mxu0 %v2809_v15  ;;  %445 = vmatprep.subr.bf16.mxu1 %v2831_v24  ;;  %v2874_v57 = vld [vmem:[#allocation8 + $0x18] sm:$0xff]   ;;  %v2875_v58 = vld [vmem:[#allocation8 + $0x60] sm:$0xff]   ;;  %v2877_v60 = vld [vmem:[#allocation8 + $0x68] sm:$0xff]   ;;  %p3237_p4 = scmp.ne.s32.totalorder %s2416_s15, %s3236_s16  ;;  %p3242_p6 = scmp.lt.s32.totalorder %s3236_s16, %s3236_s16 }
  0x5e   :  { %v2876_v59 = vld [vmem:[#allocation8 + $0x20] sm:$0xff]   ;;  %v2878_v61 = vld [vmem:[#allocation8 + $0x28] sm:$0xff]   ;;  %v2879_v9 = vld [vmem:[#allocation8 + $0x70] sm:$0xff]  }
  0x5f   :  { %v2880_v10 = vld [vmem:[#allocation8 + $0x30] sm:$0xff]   ;;  %v2881_v11 = vld [vmem:[#allocation8 + $0x78] sm:$0xff]   ;;  %v2885_v13 = vld [vmem:[#allocation5 + $0x84] ss:$8 sps:$4 sm:$0xff]   ;;  %p3243_p7 = por %p3242_p6, %p3241_p5 }
  0x60   :  { %195 = vmatpush1.bf16.msra.mxu0 %v2811_v17  ;;  %446 = vmatpush1.bf16.msra.mxu1 %v2833_v26  ;;  %v2882_v12 = vld [vmem:[#allocation8 + $0x38] sm:$0xff]   ;;  %v2907_v14 = vld [vmem:[#allocation7 + $0x100] ss:$8 sps:$4 sm:$0xff]   ;;  %v2909_v15 = vld [vmem:[#allocation7 + $0x104] ss:$8 sps:$4 sm:$0xff]   ;;  %v267_v26 = vlaneseq }
  0x61   :  { %196 = vmatprep.subr.bf16.mxu0 %v2812_v19  ;;  %447 = vmatprep.subr.bf16.mxu1 %v2834_v28  ;;  %v2912_v16 = vld [vmem:[#allocation7 + $0x114] ss:$8 sps:$4 sm:$0xff]   ;;  %v2910_v17 = vld [vmem:[#allocation7 + $0x110] ss:$8 sps:$4 sm:$0xff]   ;;  %v2915_v18 = vld [vmem:[#allocation7 + $0x124] ss:$8 sps:$4 sm:$0xff]   ;;  %p3244_p8 = pnand %p3243_p7, %p3237_p4 }
  0x62   :  { %v2913_v19 = vld [vmem:[#allocation7 + $0x120] ss:$8 sps:$4 sm:$0xff]   ;;  %v2918_v20 = vld [vmem:[#allocation7 + $0x134] ss:$8 sps:$4 sm:$0xff]   ;;  %v2921_v22 = vld [vmem:[#allocation7 + $0x144] ss:$8 sps:$4 sm:$0xff]  }
  0x63   :  { %v2924_v24 = vld [vmem:[#allocation7 + $0x154] ss:$8 sps:$4 sm:$0xff]   ;;  %v268_v28 = vshrl.u32 %v267_v26, 7 }
  0x64   :  { %197 = vmatpush1.bf16.msra.mxu0 %v2814_v21  ;;  %448 = vmatpush1.bf16.msra.mxu1 %v2836_v29  ;;  %v2916_v21 = vld [vmem:[#allocation7 + $0x130] ss:$8 sps:$4 sm:$0xff]  }
  0x65   :  { %198 = vmatprep.subr.bf16.mxu0 %v2815_v23  ;;  %449 = vmatprep.subr.bf16.mxu1 %v2837_v30  ;;  %v2919_v23 = vld [vmem:[#allocation7 + $0x140] ss:$8 sps:$4 sm:$0xff]   ;;  %v3382_v29 = vsub.s32 0, %v268_v28  ;;  %v265_v30 = vld [vmem:[%s3444_s3] sm:$0x3] }
  0x66   :  { %v2962_v26 = vld [vmem:[#allocation8 + $0x98] sm:$0xff]  }
  0x68   :  { %199 = vmatpush1.bf16.msra.mxu0 %v2817_v25  ;;  %450 = vmatpush1.bf16.msra.mxu1 %v2839_v31  ;;  %v2922_v25 = vld [vmem:[#allocation7 + $0x150] ss:$8 sps:$4 sm:$0xff]   ;;  %v3387_v31 = vsub.s32 1, %v268_v28  ;;  %v2963_v28 = vld [vmem:[#allocation8 + $0xe0] sm:$0xff]  }
  0x69   :  { %451 = vmatprep.subr.bf16.mxu1 %v2840_v32  ;;  %2696 = vmatprep.subr.bf16.mxu0 %v2867_v50  ;;  %v270_v32 = vrot.slane %v265_v30, %v3382_v29  ;;  %v2886_v50 = vld [vmem:[#allocation5 + $0x90] ss:$8 sps:$4 sm:$0xff]  }
  0x6b   :  { %217 = vmatmul.mubr.bf16.vlgmr.msra.gmra.mrb[0].mxu0 %v3379_v27 }
  0x6c   :  { %452 = vmatpush1.bf16.msra.mxu1 %v2842_v33  ;;  %2697 = vmatpush3.bf16.msra.mxu0 %v2868_v51  ;;  %v274_v33 = vrot.slane %v265_v30, %v3387_v31  ;;  %v2891_v51 = vld [vmem:[#allocation5 + $0xa4] ss:$8 sps:$4 sm:$0xff]  }
  0x6d   :  { %453 = vmatprep.subr.bf16.mxu1 %v2843_v34  ;;  %2698 = vmatprep.subr.bf16.mxu0 %v2869_v52  ;;  %v2889_v52 = vld [vmem:[#allocation5 + $0xa0] ss:$8 sps:$4 sm:$0xff]  }
  0x6e   :  { %v2964_v30 = vld [vmem:[#allocation8 + $0xa0] sm:$0xff]  }
  0x70   :  { %454 = vmatpush1.bf16.msra.mxu1 %v2845_v35  ;;  %2699 = vmatpush3.bf16.msra.mxu0 %v2870_v53  ;;  %v2894_v53 = vld [vmem:[#allocation5 + $0xb4] ss:$8 sps:$4 sm:$0xff]  }
  0x71   :  { %455 = vmatprep.subr.bf16.mxu1 %v2846_v36  ;;  %2700 = vmatprep.subr.bf16.mxu0 %v2871_v54  ;;  %v2892_v54 = vld [vmem:[#allocation5 + $0xb0] ss:$8 sps:$4 sm:$0xff]  }
  0x74   :  { %456 = vmatpush1.bf16.msra.mxu1 %v2848_v37  ;;  %2701 = vmatpush3.bf16.msra.mxu0 %v2872_v55  ;;  %v2897_v55 = vld [vmem:[#allocation5 + $0xc4] ss:$8 sps:$4 sm:$0xff]  }
  0x75   :  { %457 = vmatprep.subr.bf16.mxu1 %v2849_v38  ;;  %2702 = vmatprep.subr.bf16.mxu0 %v2873_v56  ;;  %v2895_v56 = vld [vmem:[#allocation5 + $0xc0] ss:$8 sps:$4 sm:$0xff]  }
  0x78   :  { %458 = vmatpush1.bf16.msra.mxu1 %v2851_v39  ;;  %2703 = vmatpush3.bf16.msra.mxu0 %v2874_v57  ;;  %v2900_v57 = vld [vmem:[#allocation5 + $0xd4] ss:$8 sps:$4 sm:$0xff]  }
  0x79   :  { %459 = vmatprep.subr.bf16.mxu1 %v2852_v40  ;;  %2704 = vmatprep.subr.bf16.mxu0 %v2875_v58  ;;  %v2898_v58 = vld [vmem:[#allocation5 + $0xd0] ss:$8 sps:$4 sm:$0xff]  }
  0x7c   :  { %460 = vmatpush1.bf16.msra.mxu1 %v2854_v41  ;;  %2705 = vmatpush3.bf16.msra.mxu0 %v2876_v59  ;;  %v2903_v59 = vld [vmem:[#allocation5 + $0xe4] ss:$8 sps:$4 sm:$0xff]  }
  0x7d   :  { %461 = vmatprep.subr.bf16.mxu1 %v2855_v42  ;;  %2706 = vmatprep.subr.bf16.mxu0 %v2877_v60  ;;  %v2901_v60 = vld [vmem:[#allocation5 + $0xe0] ss:$8 sps:$4 sm:$0xff]  }
  0x80   :  { %462 = vmatpush1.bf16.msra.mxu1 %v2857_v43  ;;  %2707 = vmatpush3.bf16.msra.mxu0 %v2878_v61  ;;  %v2906_v61 = vld [vmem:[#allocation5 + $0xf4] ss:$8 sps:$4 sm:$0xff]  }
  0x81   :  { %463 = vmatprep.subr.bf16.mxu1 %v2858_v44  ;;  %2708 = vmatprep.subr.bf16.mxu0 %v2879_v9  ;;  %v2937_v9 = vld [vmem:[#allocation7 + $0x1a0] ss:$8 sps:$4 sm:$0xff]  }
  0x84   :  { %464 = vmatpush1.bf16.msra.mxu1 %v2860_v45  ;;  %2709 = vmatpush3.bf16.msra.mxu0 %v2880_v10  ;;  %v2940_v10 = vld [vmem:[#allocation7 + $0x1b0] ss:$8 sps:$4 sm:$0xff]  }
  0x85   :  { %465 = vmatprep.subr.bf16.mxu1 %v2861_v46  ;;  %2710 = vmatprep.subr.bf16.mxu0 %v2881_v11  ;;  %v2945_v11 = vld [vmem:[#allocation7 + $0x1c4] ss:$8 sps:$4 sm:$0xff]  }
  0x88   :  { %466 = vmatpush1.bf16.msra.mxu1 %v2863_v47  ;;  %2711 = vmatpush3.bf16.msra.mxu0 %v2882_v12  ;;  %v2943_v12 = vld [vmem:[#allocation7 + $0x1c0] ss:$8 sps:$4 sm:$0xff]  }
  0x89   :  { %467 = vmatprep.subr.bf16.mxu1 %v2864_v48  ;;  %761 = vmatprep.subr.bf16.mxu0 %v2885_v13  ;;  %v2883_v48 = vld [vmem:[#allocation5 + $0x80] ss:$8 sps:$4 sm:$0xff]   ;;  %v2948_v13 = vld [vmem:[#allocation7 + $0x1d4] ss:$8 sps:$4 sm:$0xff]  }
  0x8c   :  { %468 = vmatpush1.bf16.msra.mxu1 %v2866_v49  ;;  %v2888_v49 = vld [vmem:[#allocation5 + $0x94] ss:$8 sps:$4 sm:$0xff]  }
  0x8d   :  { %1016 = vmatprep.subr.bf16.mxu1 %v2909_v15  ;;  %v2951_v15 = vld [vmem:[#allocation7 + $0x1e4] ss:$8 sps:$4 sm:$0xff]  }
 0x13e   :  { %v218_v62 = vpop.f32.mrb[0].mxu0 }
 0x13f   :  { %v220_v63 = vpop.f32.mrb[1].mxu0  ;;  %v227_v2 = vmax.f32 %v218_v62, 0.0  ;;  %v2904_v62 = vld [vmem:[#allocation5 + $0xf0] ss:$8 sps:$4 sm:$0xff]  }
 0x140   :  { %v222_v1 = vpop.f32.mrb[2].mxu0  ;;  %v228_v5 = vmax.f32 %v220_v63, 0.0  ;;  %v2927_v63 = vld [vmem:[#allocation7 + $0x164] ss:$8 sps:$4 sm:$0xff]  }
 0x141   :  { %v229_v3 = vmax.f32 %v222_v1, 0.0  ;;  %v224_v4 = vpop.f32.mrb[3].mxu0  ;;  %v2925_v1 = vld [vmem:[#allocation7 + $0x160] ss:$8 sps:$4 sm:$0xff]  }
 0x142   :  { %v230_v6 = vmax.f32 %v224_v4, 0.0  ;;  %v2933_v4 = vld [vmem:[#allocation7 + $0x184] ss:$8 sps:$4 sm:$0xff]  }
 0x143   :  { %v231_v7 = vpack.c.bf16 %v229_v3, %v227_v2  ;;  %v2930_v2 = vld [vmem:[#allocation7 + $0x174] ss:$8 sps:$4 sm:$0xff]   ;;  %v2928_v3 = vld [vmem:[#allocation7 + $0x170] ss:$8 sps:$4 sm:$0xff]  }
 0x144   :  { %v232_v8 = vpack.c.bf16 %v230_v6, %v228_v5  ;;  %v2931_v5 = vld [vmem:[#allocation7 + $0x180] ss:$8 sps:$4 sm:$0xff]   ;;  %v2936_v6 = vld [vmem:[#allocation7 + $0x194] ss:$8 sps:$4 sm:$0xff]  }
 0x146   :  { %469 = vmatprep.mubr.bf16.mxu1 %v232_v8  ;;  %v2939_v8 = vld [vmem:[#allocation7 + $0x1a4] ss:$8 sps:$4 sm:$0xff]  }
 0x147   :  { %470 = vmatmul.mubr.bf16.vlgmr.msra.gmra.mrb[0].mxu1 %v231_v7  ;;  %v2934_v7 = vld [vmem:[#allocation7 + $0x190] ss:$8 sps:$4 sm:$0xff]  }
 0x148   :  { %1017 = vmatpush1.bf16.msra.mxu1 %v2907_v14  ;;  %v2946_v14 = vld [vmem:[#allocation7 + $0x1d0] ss:$8 sps:$4 sm:$0xff]  }
 0x149   :  { %1018 = vmatprep.subr.bf16.mxu1 %v2912_v16  ;;  %v2949_v16 = vld [vmem:[#allocation7 + $0x1e0] ss:$8 sps:$4 sm:$0xff]  }
 0x14c   :  { %1019 = vmatpush1.bf16.msra.mxu1 %v2910_v17  ;;  %v2954_v17 = vld [vmem:[#allocation7 + $0x1f4] ss:$8 sps:$4 sm:$0xff]  }
 0x14d   :  { %1020 = vmatprep.subr.bf16.mxu1 %v2915_v18  ;;  %v2952_v18 = vld [vmem:[#allocation7 + $0x1f0] ss:$8 sps:$4 sm:$0xff]  }
 0x150   :  { %1021 = vmatpush1.bf16.msra.mxu1 %v2913_v19  ;;  %v2955_v19 = vld [vmem:[#allocation8 + $0xc0] sm:$0xff]  }
 0x151   :  { %1022 = vmatprep.subr.bf16.mxu1 %v2918_v20  ;;  %v2956_v20 = vld [vmem:[#allocation8 + $0x80] sm:$0xff]  }
 0x154   :  { %1023 = vmatpush1.bf16.msra.mxu1 %v2916_v21  ;;  %v2957_v21 = vld [vmem:[#allocation8 + $0xc8] sm:$0xff]  }
 0x155   :  { %1024 = vmatprep.subr.bf16.mxu1 %v2921_v22  ;;  %v2958_v22 = vld [vmem:[#allocation8 + $0x88] sm:$0xff]  }
 0x158   :  { %1025 = vmatpush1.bf16.msra.mxu1 %v2919_v23  ;;  %v2959_v23 = vld [vmem:[#allocation8 + $0xd0] sm:$0xff]  }
 0x159   :  { %1026 = vmatprep.subr.bf16.mxu1 %v2924_v24  ;;  %v2960_v24 = vld [vmem:[#allocation8 + $0x90] sm:$0xff]  }
 0x15c   :  { %1027 = vmatpush1.bf16.msra.mxu1 %v2922_v25  ;;  %v2961_v25 = vld [vmem:[#allocation8 + $0xd8] sm:$0xff]  }
 0x15d   :  { %1028 = vmatprep.subr.bf16.mxu1 %v2927_v63  ;;  %v3001_v63 = vld [vmem:[#allocation7 + $0x220] ss:$8 sps:$4 sm:$0xff]  }
 0x160   :  { %1029 = vmatpush1.bf16.msra.mxu1 %v2925_v1  ;;  %v3006_v1 = vld [vmem:[#allocation7 + $0x234] ss:$8 sps:$4 sm:$0xff]  }
 0x161   :  { %1030 = vmatprep.subr.bf16.mxu1 %v2930_v2  ;;  %v3004_v2 = vld [vmem:[#allocation7 + $0x230] ss:$8 sps:$4 sm:$0xff]  }
 0x164   :  { %1031 = vmatpush1.bf16.msra.mxu1 %v2928_v3  ;;  %v3009_v3 = vld [vmem:[#allocation7 + $0x244] ss:$8 sps:$4 sm:$0xff]  }
 0x165   :  { %1032 = vmatprep.subr.bf16.mxu1 %v2933_v4  ;;  %v3007_v4 = vld [vmem:[#allocation7 + $0x240] ss:$8 sps:$4 sm:$0xff]  }
 0x168   :  { %1033 = vmatpush1.bf16.msra.mxu1 %v2931_v5  ;;  %v3012_v5 = vld [vmem:[#allocation7 + $0x254] ss:$8 sps:$4 sm:$0xff]  }
 0x169   :  { %1034 = vmatprep.subr.bf16.mxu1 %v2936_v6  ;;  %v3010_v6 = vld [vmem:[#allocation7 + $0x250] ss:$8 sps:$4 sm:$0xff]  }
 0x16c   :  { %1035 = vmatpush1.bf16.msra.mxu1 %v2934_v7  ;;  %v2511_v7 = vld [vmem:[%s3444_s3 + $0x2] sm:$0x3] }
 0x16d   :  { %1036 = vmatprep.subr.bf16.mxu1 %v2939_v8  ;;  %v849_v8 = vrot.slane %v2511_v7, %v3382_v29 }
 0x170   :  { %1037 = vmatpush1.bf16.msra.mxu1 %v2937_v9  ;;  %v853_v9 = vrot.slane %v2511_v7, %v3387_v31  ;;  %v3051_v7 = vld [vmem:[#allocation8 + $0x160] sm:$0xff]  }
 0x21a   :  { %v471_v34 = vpop.f32.mrb[0].mxu1 }
 0x21b   :  { %v472_v35 = vadd.f32 %v471_v34, %v270_v32  ;;  %v473_v36 = vpop.f32.mrb[1].mxu1 }
 0x21c   :  { %v474_v37 = vadd.f32 %v473_v36, %v274_v33  ;;  %v475_v38 = vpop.f32.mrb[2].mxu1 }
 0x21d   :  { %v476_v39 = vadd.f32 %v475_v38, %v270_v32  ;;  %v477_v40 = vpop.f32.mrb[3].mxu1  ;;  %v480_v42 = vmax.f32 %v472_v35, 0.0  ;;  %v2965_v32 = vld [vmem:[#allocation8 + $0xe8] sm:$0xff]   ;;  %v2478_v35 = vld [vmem:[%s3446_s5] ss:$0 sm:$0xff] }
 0x21e   :  { %v478_v41 = vadd.f32 %v477_v40, %v274_v33  ;;  %v481_v44 = vmax.f32 %v474_v37, 0.0  ;;  %v2966_v33 = vld [vmem:[#allocation8 + $0xa8] sm:$0xff]  }
 0x21f   :  { %v482_v43 = vmax.f32 %v476_v39, 0.0 }
 0x220   :  { %v483_v45 = vmax.f32 %v478_v41, 0.0 }
 0x221   :  { %v484_v46 = vpack.c.bf16 %v482_v43, %v480_v42 }
 0x222   :  { %v485_v47 = vpack.c.bf16 %v483_v45, %v481_v44 }
 0x224   :  { %653 = vmatprep.mubr.bf16.mxu0 %v485_v47 }
 0x225   :  { %654 = vmatmul.mubr.bf16.vlgmr.msra.gmra.mrb[4].mxu0 %v484_v46 }
 0x226   :  { %762 = vmatpush1.bf16.msra.mxu0 %v2883_v48  ;;  %793 = vmatprep.mubr.bf16.mxu0 %v3274_v0 }
 0x227   :  { %763 = vmatprep.subr.bf16.mxu0 %v2888_v49 }
 0x22a   :  { %764 = vmatpush1.bf16.msra.mxu0 %v2886_v50 }
 0x22b   :  { %765 = vmatprep.subr.bf16.mxu0 %v2891_v51 }
 0x22e   :  { %766 = vmatpush1.bf16.msra.mxu0 %v2889_v52 }
 0x22f   :  { %767 = vmatprep.subr.bf16.mxu0 %v2894_v53  ;;  %v2967_v53 = vld [vmem:[#allocation8 + $0xf0] sm:$0xff]  }
 0x232   :  { %768 = vmatpush1.bf16.msra.mxu0 %v2892_v54  ;;  %v2968_v54 = vld [vmem:[#allocation8 + $0xb0] sm:$0xff]  }
 0x233   :  { %769 = vmatprep.subr.bf16.mxu0 %v2897_v55  ;;  %v2969_v55 = vld [vmem:[#allocation8 + $0xf8] sm:$0xff]  }
 0x236   :  { %770 = vmatpush1.bf16.msra.mxu0 %v2895_v56  ;;  %v2970_v56 = vld [vmem:[#allocation8 + $0xb8] sm:$0xff]  }
 0x237   :  { %771 = vmatprep.subr.bf16.mxu0 %v2900_v57  ;;  %v2973_v57 = vld [vmem:[#allocation5 + $0x104] ss:$8 sps:$4 sm:$0xff]  }
 0x23a   :  { %772 = vmatpush1.bf16.msra.mxu0 %v2898_v58  ;;  %v2995_v58 = vld [vmem:[#allocation7 + $0x200] ss:$8 sps:$4 sm:$0xff]  }
 0x23b   :  { %773 = vmatprep.subr.bf16.mxu0 %v2903_v59  ;;  %v2997_v59 = vld [vmem:[#allocation7 + $0x204] ss:$8 sps:$4 sm:$0xff]  }
 0x23e   :  { %774 = vmatpush1.bf16.msra.mxu0 %v2901_v60  ;;  %v3000_v60 = vld [vmem:[#allocation7 + $0x214] ss:$8 sps:$4 sm:$0xff]  }
 0x23f   :  { %775 = vmatprep.subr.bf16.mxu0 %v2906_v61  ;;  %v2998_v61 = vld [vmem:[#allocation7 + $0x210] ss:$8 sps:$4 sm:$0xff]  }
 0x242   :  { %776 = vmatpush1.bf16.msra.mxu0 %v2904_v62  ;;  %v3003_v62 = vld [vmem:[#allocation7 + $0x224] ss:$8 sps:$4 sm:$0xff]  }
 0x243   :  { %2718 = vmatprep.subr.bf16.mxu0 %v2955_v19 }
 0x245   :  { %794 = vmatmul.mubr.bf16.vlgmr.msra.gmra.mrb[8].mxu0 %v3379_v27  ;;  %v2942_v27 = vld [vmem:[#allocation7 + $0x1b4] ss:$8 sps:$4 sm:$0xff]  }
 0x246   :  { %1038 = vmatprep.subr.bf16.mxu1 %v2942_v27  ;;  %2719 = vmatpush3.bf16.msra.mxu0 %v2956_v20 }
 0x247   :  { %1039 = vmatpush1.bf16.msra.mxu1 %v2940_v10  ;;  %2720 = vmatprep.subr.bf16.mxu0 %v2957_v21 }
 0x248   :  { %1040 = vmatprep.subr.bf16.mxu1 %v2945_v11 }
 0x24a   :  { %2721 = vmatpush3.bf16.msra.mxu0 %v2958_v22 }
 0x24b   :  { %1041 = vmatpush1.bf16.msra.mxu1 %v2943_v12  ;;  %2722 = vmatprep.subr.bf16.mxu0 %v2959_v23  ;;  %v2971_v23 = vld [vmem:[#allocation5 + $0x100] ss:$8 sps:$4 sm:$0xff]  }
 0x24c   :  { %1042 = vmatprep.subr.bf16.mxu1 %v2948_v13 }
 0x24e   :  { %2723 = vmatpush3.bf16.msra.mxu0 %v2960_v24  ;;  %v2976_v24 = vld [vmem:[#allocation5 + $0x114] ss:$8 sps:$4 sm:$0xff]  }
 0x24f   :  { %1043 = vmatpush1.bf16.msra.mxu1 %v2946_v14  ;;  %2724 = vmatprep.subr.bf16.mxu0 %v2961_v25  ;;  %v2974_v25 = vld [vmem:[#allocation5 + $0x110] ss:$8 sps:$4 sm:$0xff]  }
 0x250   :  { %1044 = vmatprep.subr.bf16.mxu1 %v2951_v15 }
 0x252   :  { %2725 = vmatpush3.bf16.msra.mxu0 %v2962_v26  ;;  %v2979_v26 = vld [vmem:[#allocation5 + $0x124] ss:$8 sps:$4 sm:$0xff]  }
 0x253   :  { %1045 = vmatpush1.bf16.msra.mxu1 %v2949_v16  ;;  %2726 = vmatprep.subr.bf16.mxu0 %v2963_v28  ;;  %v2977_v28 = vld [vmem:[#allocation5 + $0x120] ss:$8 sps:$4 sm:$0xff]  }
 0x254   :  { %1046 = vmatprep.subr.bf16.mxu1 %v2954_v17 }
 0x256   :  { %2727 = vmatpush3.bf16.msra.mxu0 %v2964_v30  ;;  %v2982_v30 = vld [vmem:[#allocation5 + $0x134] ss:$8 sps:$4 sm:$0xff]  }
 0x257   :  { %1047 = vmatpush1.bf16.msra.mxu1 %v2952_v18  ;;  %2728 = vmatprep.subr.bf16.mxu0 %v2965_v32  ;;  %v2980_v32 = vld [vmem:[#allocation5 + $0x130] ss:$8 sps:$4 sm:$0xff]  }
 0x258   :  { %1598 = vmatprep.subr.bf16.mxu1 %v2997_v59  ;;  %v3037_v59 = vld [vmem:[#allocation7 + $0x2e0] ss:$8 sps:$4 sm:$0xff]  }
 0x25a   :  { %2729 = vmatpush3.bf16.msra.mxu0 %v2966_v33  ;;  %v2985_v33 = vld [vmem:[#allocation5 + $0x144] ss:$8 sps:$4 sm:$0xff]  }
 0x25b   :  { %2730 = vmatprep.subr.bf16.mxu0 %v2967_v53  ;;  %v3028_v53 = vld [vmem:[#allocation7 + $0x2b0] ss:$8 sps:$4 sm:$0xff]  }
 0x25e   :  { %2731 = vmatpush3.bf16.msra.mxu0 %v2968_v54  ;;  %v3033_v54 = vld [vmem:[#allocation7 + $0x2c4] ss:$8 sps:$4 sm:$0xff]  }
 0x25f   :  { %2732 = vmatprep.subr.bf16.mxu0 %v2969_v55  ;;  %v3031_v55 = vld [vmem:[#allocation7 + $0x2c0] ss:$8 sps:$4 sm:$0xff]  }
 0x262   :  { %2733 = vmatpush3.bf16.msra.mxu0 %v2970_v56  ;;  %v3036_v56 = vld [vmem:[#allocation7 + $0x2d4] ss:$8 sps:$4 sm:$0xff]  }
 0x263   :  { %1343 = vmatprep.subr.bf16.mxu0 %v2973_v57  ;;  %v3034_v57 = vld [vmem:[#allocation7 + $0x2d0] ss:$8 sps:$4 sm:$0xff]  }
 0x2f8   :  { %v2712_v34 = vpop.f32.mrb[4].mxu0 }
 0x2f9   :  { %v2713_v36 = vpop.f32.mrb[5].mxu0 }
 0x2fa   :  { %v2714_v37 = vadd.f32 %v2713_v36, %v2712_v34  ;;  %v2715_v38 = vpop.f32.mrb[6].mxu0  ;;  %v2983_v34 = vld [vmem:[#allocation5 + $0x140] ss:$8 sps:$4 sm:$0xff]   ;;  %v2986_v36 = vld [vmem:[#allocation5 + $0x150] ss:$8 sps:$4 sm:$0xff]  }
 0x2fb   :  { %v2716_v39 = vpop.f32.mrb[7].mxu0 }
 0x2fc   :  { %v656_v40 = vadd.f32 %v2714_v37, %v2478_v35  ;;  %v2717_v41 = vadd.f32 %v2716_v39, %v2715_v38  ;;  %v2991_v37 = vld [vmem:[#allocation5 + $0x164] ss:$8 sps:$4 sm:$0xff]   ;;  %v2989_v38 = vld [vmem:[#allocation5 + $0x160] ss:$8 sps:$4 sm:$0xff]   ;;  %v2994_v39 = vld [vmem:[#allocation5 + $0x174] ss:$8 sps:$4 sm:$0xff]  }
 0x2fe   :  { %662 = vst [vmem:[#allocation10] sm:$0xff] %v656_v40  ;;  %v659_v42 = vadd.f32 %v2717_v41, %v2478_v35  ;;  %v2988_v35 = vld [vmem:[#allocation5 + $0x154] ss:$8 sps:$4 sm:$0xff]   ;;  %v2992_v40 = vld [vmem:[#allocation5 + $0x170] ss:$8 sps:$4 sm:$0xff]  }
 0x2ff   :  { %v3402_v41 = vld [vmem:[#allocation2] sm:$0xff]  }
 0x300   :  { %663 = vst [vmem:[#allocation10 + $0x8] sm:$0xff] %v659_v42  ;;  %v3015_v42 = vld [vmem:[#allocation7 + $0x264] ss:$8 sps:$4 sm:$0xff]  }
 0x318   :  { %v795_v43 = vpop.f32.mrb[8].mxu0 }
 0x319   :  { %v797_v44 = vpop.f32.mrb[9].mxu0  ;;  %v804_v46 = vmax.f32 %v795_v43, 0.0  ;;  %v3013_v43 = vld [vmem:[#allocation7 + $0x260] ss:$8 sps:$4 sm:$0xff]  }
 0x31a   :  { %v799_v45 = vpop.f32.mrb[10].mxu0  ;;  %v805_v49 = vmax.f32 %v797_v44, 0.0  ;;  %v3018_v44 = vld [vmem:[#allocation7 + $0x274] ss:$8 sps:$4 sm:$0xff]  }
 0x31b   :  { %v806_v47 = vmax.f32 %v799_v45, 0.0  ;;  %v801_v48 = vpop.f32.mrb[11].mxu0  ;;  %v3016_v45 = vld [vmem:[#allocation7 + $0x270] ss:$8 sps:$4 sm:$0xff]  }
 0x31c   :  { %v807_v50 = vmax.f32 %v801_v48, 0.0  ;;  %v3024_v48 = vld [vmem:[#allocation7 + $0x294] ss:$8 sps:$4 sm:$0xff]  }
 0x31d   :  { %v808_v51 = vpack.c.bf16 %v806_v47, %v804_v46  ;;  %v3021_v46 = vld [vmem:[#allocation7 + $0x284] ss:$8 sps:$4 sm:$0xff]   ;;  %v3019_v47 = vld [vmem:[#allocation7 + $0x280] ss:$8 sps:$4 sm:$0xff]  }
 0x31e   :  { %v809_v52 = vpack.c.bf16 %v807_v50, %v805_v49  ;;  %v3022_v49 = vld [vmem:[#allocation7 + $0x290] ss:$8 sps:$4 sm:$0xff]   ;;  %v3027_v50 = vld [vmem:[#allocation7 + $0x2a4] ss:$8 sps:$4 sm:$0xff]  }
 0x320   :  { %1048 = vmatprep.mubr.bf16.mxu1 %v809_v52  ;;  %v3030_v52 = vld [vmem:[#allocation7 + $0x2b4] ss:$8 sps:$4 sm:$0xff]  }
 0x321   :  { %1049 = vmatmul.mubr.bf16.vlgmr.msra.gmra.mrb[4].mxu1 %v808_v51  ;;  %v3025_v51 = vld [vmem:[#allocation7 + $0x2a0] ss:$8 sps:$4 sm:$0xff]  }
 0x322   :  { %1599 = vmatpush1.bf16.msra.mxu1 %v2995_v58  ;;  %v3039_v58 = vld [vmem:[#allocation7 + $0x2e4] ss:$8 sps:$4 sm:$0xff]  }
 0x323   :  { %1600 = vmatprep.subr.bf16.mxu1 %v3000_v60  ;;  %v3042_v60 = vld [vmem:[#allocation7 + $0x2f4] ss:$8 sps:$4 sm:$0xff]  }
 0x326   :  { %1601 = vmatpush1.bf16.msra.mxu1 %v2998_v61  ;;  %v3040_v61 = vld [vmem:[#allocation7 + $0x2f0] ss:$8 sps:$4 sm:$0xff]  }
 0x327   :  { %1602 = vmatprep.subr.bf16.mxu1 %v3003_v62  ;;  %v3043_v62 = vld [vmem:[#allocation8 + $0x140] sm:$0xff]  }
 0x32a   :  { %1603 = vmatpush1.bf16.msra.mxu1 %v3001_v63  ;;  %v3044_v63 = vld [vmem:[#allocation8 + $0x100] sm:$0xff]  }
 0x32b   :  { %1604 = vmatprep.subr.bf16.mxu1 %v3006_v1  ;;  %v3045_v1 = vld [vmem:[#allocation8 + $0x148] sm:$0xff]  }
 0x32e   :  { %1605 = vmatpush1.bf16.msra.mxu1 %v3004_v2  ;;  %v3046_v2 = vld [vmem:[#allocation8 + $0x108] sm:$0xff]  }
 0x32f   :  { %1606 = vmatprep.subr.bf16.mxu1 %v3009_v3  ;;  %v3047_v3 = vld [vmem:[#allocation8 + $0x150] sm:$0xff]  }
 0x332   :  { %1607 = vmatpush1.bf16.msra.mxu1 %v3007_v4  ;;  %v3048_v4 = vld [vmem:[#allocation8 + $0x110] sm:$0xff]  }
 0x333   :  { %1608 = vmatprep.subr.bf16.mxu1 %v3012_v5  ;;  %v3049_v5 = vld [vmem:[#allocation8 + $0x158] sm:$0xff]  }
 0x336   :  { %1609 = vmatpush1.bf16.msra.mxu1 %v3010_v6  ;;  %v3050_v6 = vld [vmem:[#allocation8 + $0x118] sm:$0xff]  }
 0x337   :  { %1610 = vmatprep.subr.bf16.mxu1 %v3015_v42  ;;  %v3091_v42 = vld [vmem:[#allocation7 + $0x324] ss:$8 sps:$4 sm:$0xff]  }
 0x33a   :  { %1611 = vmatpush1.bf16.msra.mxu1 %v3013_v43  ;;  %v3089_v43 = vld [vmem:[#allocation7 + $0x320] ss:$8 sps:$4 sm:$0xff]  }
 0x33b   :  { %1612 = vmatprep.subr.bf16.mxu1 %v3018_v44  ;;  %v3094_v44 = vld [vmem:[#allocation7 + $0x334] ss:$8 sps:$4 sm:$0xff]  }
 0x33e   :  { %1613 = vmatpush1.bf16.msra.mxu1 %v3016_v45  ;;  %v3092_v45 = vld [vmem:[#allocation7 + $0x330] ss:$8 sps:$4 sm:$0xff]  }
 0x33f   :  { %1614 = vmatprep.subr.bf16.mxu1 %v3021_v46  ;;  %v3097_v46 = vld [vmem:[#allocation7 + $0x344] ss:$8 sps:$4 sm:$0xff]  }
 0x342   :  { %1615 = vmatpush1.bf16.msra.mxu1 %v3019_v47  ;;  %v3095_v47 = vld [vmem:[#allocation7 + $0x340] ss:$8 sps:$4 sm:$0xff]  }
 0x343   :  { %1616 = vmatprep.subr.bf16.mxu1 %v3024_v48  ;;  %v3100_v48 = vld [vmem:[#allocation7 + $0x354] ss:$8 sps:$4 sm:$0xff]  }
 0x346   :  { %1617 = vmatpush1.bf16.msra.mxu1 %v3022_v49  ;;  %v3098_v49 = vld [vmem:[#allocation7 + $0x350] ss:$8 sps:$4 sm:$0xff]  }
 0x347   :  { %1618 = vmatprep.subr.bf16.mxu1 %v3027_v50  ;;  %v2578_v50 = vld [vmem:[%s3444_s3 + $0x4] sm:$0x3] }
 0x34a   :  { %1619 = vmatpush1.bf16.msra.mxu1 %v3025_v51  ;;  %v1431_v51 = vrot.slane %v2578_v50, %v3382_v29 }
 0x34b   :  { %1620 = vmatprep.subr.bf16.mxu1 %v3030_v52  ;;  %v1435_v52 = vrot.slane %v2578_v50, %v3387_v31  ;;  %v3141_v50 = vld [vmem:[#allocation8 + $0x1e8] sm:$0xff]  }
 0x34e   :  { %1621 = vmatpush1.bf16.msra.mxu1 %v3028_v53 }
 0x34f   :  { %1622 = vmatprep.subr.bf16.mxu1 %v3033_v54 }
 0x352   :  { %1623 = vmatpush1.bf16.msra.mxu1 %v3031_v55 }
 0x353   :  { %1624 = vmatprep.subr.bf16.mxu1 %v3036_v56 }
 0x356   :  { %1625 = vmatpush1.bf16.msra.mxu1 %v3034_v57 }
 0x357   :  { %1626 = vmatprep.subr.bf16.mxu1 %v3039_v58 }
 0x35a   :  { %1627 = vmatpush1.bf16.msra.mxu1 %v3037_v59 }
 0x35b   :  { %1628 = vmatprep.subr.bf16.mxu1 %v3042_v60 }
 0x35e   :  { %1629 = vmatpush1.bf16.msra.mxu1 %v3040_v61 }
 0x3f4   :  { %v1050_v27 = vpop.f32.mrb[4].mxu1 }
 0x3f5   :  { %v1051_v10 = vadd.f32 %v1050_v27, %v849_v8  ;;  %v1052_v11 = vpop.f32.mrb[5].mxu1  ;;  %v3054_v27 = vld [vmem:[#allocation8 + $0x128] sm:$0xff]  }
 0x3f6   :  { %v1053_v12 = vadd.f32 %v1052_v11, %v853_v9  ;;  %v1054_v13 = vpop.f32.mrb[6].mxu1  ;;  %v2545_v11 = vld [vmem:[%s3446_s5 + $0x1] ss:$0 sm:$0xff] }
 0x3f7   :  { %v1055_v14 = vadd.f32 %v1054_v13, %v849_v8  ;;  %v1056_v15 = vpop.f32.mrb[7].mxu1  ;;  %v1059_v17 = vmax.f32 %v1051_v10, 0.0  ;;  %v3052_v8 = vld [vmem:[#allocation8 + $0x120] sm:$0xff]  }
 0x3f8   :  { %v1057_v16 = vadd.f32 %v1056_v15, %v853_v9  ;;  %v1060_v19 = vmax.f32 %v1053_v12, 0.0  ;;  %v3053_v9 = vld [vmem:[#allocation8 + $0x168] sm:$0xff]  }
 0x3f9   :  { %v1061_v18 = vmax.f32 %v1055_v14, 0.0 }
 0x3fa   :  { %v1062_v20 = vmax.f32 %v1057_v16, 0.0 }
 0x3fb   :  { %v1063_v21 = vpack.c.bf16 %v1061_v18, %v1059_v17 }
 0x3fc   :  { %v1064_v22 = vpack.c.bf16 %v1062_v20, %v1060_v19 }
 0x3fe   :  { %1234 = vmatprep.mubr.bf16.mxu0 %v1064_v22 }
 0x3ff   :  { %1235 = vmatmul.mubr.bf16.vlgmr.msra.gmra.mrb[12].mxu0 %v1063_v21 }
 0x400   :  { %1344 = vmatpush1.bf16.msra.mxu0 %v2971_v23  ;;  %1375 = vmatprep.mubr.bf16.mxu0 %v3274_v0 }
 0x401   :  { %1345 = vmatprep.subr.bf16.mxu0 %v2976_v24 }
 0x404   :  { %1346 = vmatpush1.bf16.msra.mxu0 %v2974_v25 }
 0x405   :  { %1347 = vmatprep.subr.bf16.mxu0 %v2979_v26 }
 0x408   :  { %1348 = vmatpush1.bf16.msra.mxu0 %v2977_v28 }
 0x409   :  { %1349 = vmatprep.subr.bf16.mxu0 %v2982_v30 }
 0x40c   :  { %1350 = vmatpush1.bf16.msra.mxu0 %v2980_v32  ;;  %v3055_v32 = vld [vmem:[#allocation8 + $0x170] sm:$0xff]  }
 0x40d   :  { %1351 = vmatprep.subr.bf16.mxu0 %v2985_v33  ;;  %v3056_v33 = vld [vmem:[#allocation8 + $0x130] sm:$0xff]  }
 0x410   :  { %1352 = vmatpush1.bf16.msra.mxu0 %v2983_v34  ;;  %v3057_v34 = vld [vmem:[#allocation8 + $0x178] sm:$0xff]  }
 0x411   :  { %1353 = vmatprep.subr.bf16.mxu0 %v2988_v35  ;;  %v3058_v35 = vld [vmem:[#allocation8 + $0x138] sm:$0xff]  }
 0x414   :  { %1354 = vmatpush1.bf16.msra.mxu0 %v2986_v36  ;;  %v3061_v36 = vld [vmem:[#allocation5 + $0x184] ss:$8 sps:$4 sm:$0xff]  }
 0x415   :  { %1355 = vmatprep.subr.bf16.mxu0 %v2991_v37  ;;  %v3083_v37 = vld [vmem:[#allocation7 + $0x300] ss:$8 sps:$4 sm:$0xff]  }
 0x418   :  { %1356 = vmatpush1.bf16.msra.mxu0 %v2989_v38  ;;  %v3085_v38 = vld [vmem:[#allocation7 + $0x304] ss:$8 sps:$4 sm:$0xff]  }
 0x419   :  { %1357 = vmatprep.subr.bf16.mxu0 %v2994_v39  ;;  %v3088_v39 = vld [vmem:[#allocation7 + $0x314] ss:$8 sps:$4 sm:$0xff]   ;;  %2180 = vmatprep.subr.bf16.mxu1 %v3085_v38  ;;  %v3128_v38 = vld [vmem:[#allocation7 + $0x3f0] ss:$8 sps:$4 sm:$0xff]  }
 0x41c   :  { %1358 = vmatpush1.bf16.msra.mxu0 %v2992_v40  ;;  %v3086_v40 = vld [vmem:[#allocation7 + $0x310] ss:$8 sps:$4 sm:$0xff]  }
 0x41d   :  { %2740 = vmatprep.subr.bf16.mxu0 %v3043_v62 }
 0x41f   :  { %1376 = vmatmul.mubr.bf16.vlgmr.msra.gmra.mrb[16].mxu0 %v3402_v41 }
 0x420   :  { %2741 = vmatpush3.bf16.msra.mxu0 %v3044_v63 }
 0x421   :  { %2742 = vmatprep.subr.bf16.mxu0 %v3045_v1 }
 0x424   :  { %2743 = vmatpush3.bf16.msra.mxu0 %v3046_v2 }
 0x425   :  { %2744 = vmatprep.subr.bf16.mxu0 %v3047_v3 }
 0x428   :  { %2745 = vmatpush3.bf16.msra.mxu0 %v3048_v4  ;;  %v3059_v4 = vld [vmem:[#allocation5 + $0x180] ss:$8 sps:$4 sm:$0xff]  }
 0x429   :  { %2746 = vmatprep.subr.bf16.mxu0 %v3049_v5  ;;  %v3064_v5 = vld [vmem:[#allocation5 + $0x194] ss:$8 sps:$4 sm:$0xff]  }
 0x42c   :  { %2747 = vmatpush3.bf16.msra.mxu0 %v3050_v6  ;;  %v3062_v6 = vld [vmem:[#allocation5 + $0x190] ss:$8 sps:$4 sm:$0xff]  }
 0x42d   :  { %2748 = vmatprep.subr.bf16.mxu0 %v3051_v7  ;;  %v3067_v7 = vld [vmem:[#allocation5 + $0x1a4] ss:$8 sps:$4 sm:$0xff]  }
 0x430   :  { %2749 = vmatpush3.bf16.msra.mxu0 %v3052_v8  ;;  %v3065_v8 = vld [vmem:[#allocation5 + $0x1a0] ss:$8 sps:$4 sm:$0xff]  }
 0x431   :  { %2750 = vmatprep.subr.bf16.mxu0 %v3053_v9  ;;  %v3070_v9 = vld [vmem:[#allocation5 + $0x1b4] ss:$8 sps:$4 sm:$0xff]  }
 0x434   :  { %2751 = vmatpush3.bf16.msra.mxu0 %v3054_v27  ;;  %v3068_v27 = vld [vmem:[#allocation5 + $0x1b0] ss:$8 sps:$4 sm:$0xff]  }
 0x435   :  { %2752 = vmatprep.subr.bf16.mxu0 %v3055_v32  ;;  %v3119_v32 = vld [vmem:[#allocation7 + $0x3c0] ss:$8 sps:$4 sm:$0xff]  }
 0x438   :  { %2753 = vmatpush3.bf16.msra.mxu0 %v3056_v33  ;;  %v3124_v33 = vld [vmem:[#allocation7 + $0x3d4] ss:$8 sps:$4 sm:$0xff]  }
 0x439   :  { %2754 = vmatprep.subr.bf16.mxu0 %v3057_v34  ;;  %v3122_v34 = vld [vmem:[#allocation7 + $0x3d0] ss:$8 sps:$4 sm:$0xff]  }
 0x43c   :  { %2755 = vmatpush3.bf16.msra.mxu0 %v3058_v35  ;;  %v3127_v35 = vld [vmem:[#allocation7 + $0x3e4] ss:$8 sps:$4 sm:$0xff]  }
 0x43d   :  { %1925 = vmatprep.subr.bf16.mxu0 %v3061_v36  ;;  %v3125_v36 = vld [vmem:[#allocation7 + $0x3e0] ss:$8 sps:$4 sm:$0xff]  }
 0x4d2   :  { %v2734_v10 = vpop.f32.mrb[12].mxu0 }
 0x4d3   :  { %v2735_v12 = vpop.f32.mrb[13].mxu0 }
 0x4d4   :  { %v2736_v13 = vadd.f32 %v2735_v12, %v2734_v10  ;;  %v2737_v14 = vpop.f32.mrb[14].mxu0  ;;  %v3073_v10 = vld [vmem:[#allocation5 + $0x1c4] ss:$8 sps:$4 sm:$0xff]   ;;  %v3076_v12 = vld [vmem:[#allocation5 + $0x1d4] ss:$8 sps:$4 sm:$0xff]  }
 0x4d5   :  { %v2738_v15 = vpop.f32.mrb[15].mxu0 }
 0x4d6   :  { %v1237_v16 = vadd.f32 %v2736_v13, %v2545_v11  ;;  %v2739_v17 = vadd.f32 %v2738_v15, %v2737_v14  ;;  %v3074_v13 = vld [vmem:[#allocation5 + $0x1d0] ss:$8 sps:$4 sm:$0xff]   ;;  %v3079_v14 = vld [vmem:[#allocation5 + $0x1e4] ss:$8 sps:$4 sm:$0xff]   ;;  %v3082_v15 = vld [vmem:[#allocation5 + $0x1f4] ss:$8 sps:$4 sm:$0xff]  }
 0x4d8   :  { %1244 = vst [vmem:[#allocation10 + $0x10] sm:$0xff] %v1237_v16  ;;  %v1240_v18 = vadd.f32 %v2739_v17, %v2545_v11  ;;  %v3071_v11 = vld [vmem:[#allocation5 + $0x1c0] ss:$8 sps:$4 sm:$0xff]   ;;  %v3080_v16 = vld [vmem:[#allocation5 + $0x1f0] ss:$8 sps:$4 sm:$0xff]  }
 0x4d9   :  { %v3103_v17 = vld [vmem:[#allocation7 + $0x364] ss:$8 sps:$4 sm:$0xff]  }
 0x4da   :  { %1245 = vst [vmem:[#allocation10 + $0x18] sm:$0xff] %v1240_v18  ;;  %v3101_v18 = vld [vmem:[#allocation7 + $0x360] ss:$8 sps:$4 sm:$0xff]  }
 0x4f2   :  { %v1377_v19 = vpop.f32.mrb[16].mxu0 }
 0x4f3   :  { %v1379_v20 = vpop.f32.mrb[17].mxu0  ;;  %v1386_v22 = vmax.f32 %v1377_v19, 0.0  ;;  %v3106_v19 = vld [vmem:[#allocation7 + $0x374] ss:$8 sps:$4 sm:$0xff]  }
 0x4f4   :  { %v1381_v21 = vpop.f32.mrb[18].mxu0  ;;  %v1387_v25 = vmax.f32 %v1379_v20, 0.0  ;;  %v3104_v20 = vld [vmem:[#allocation7 + $0x370] ss:$8 sps:$4 sm:$0xff]  }
 0x4f5   :  { %v1388_v23 = vmax.f32 %v1381_v21, 0.0  ;;  %v1383_v24 = vpop.f32.mrb[19].mxu0  ;;  %v3109_v21 = vld [vmem:[#allocation7 + $0x384] ss:$8 sps:$4 sm:$0xff]  }
 0x4f6   :  { %v1389_v26 = vmax.f32 %v1383_v24, 0.0  ;;  %v3110_v24 = vld [vmem:[#allocation7 + $0x390] ss:$8 sps:$4 sm:$0xff]  }
 0x4f7   :  { %v1390_v28 = vpack.c.bf16 %v1388_v23, %v1386_v22  ;;  %v3107_v22 = vld [vmem:[#allocation7 + $0x380] ss:$8 sps:$4 sm:$0xff]   ;;  %v3112_v23 = vld [vmem:[#allocation7 + $0x394] ss:$8 sps:$4 sm:$0xff]  }
 0x4f8   :  { %v1391_v30 = vpack.c.bf16 %v1389_v26, %v1387_v25  ;;  %v3115_v25 = vld [vmem:[#allocation7 + $0x3a4] ss:$8 sps:$4 sm:$0xff]   ;;  %v3113_v26 = vld [vmem:[#allocation7 + $0x3a0] ss:$8 sps:$4 sm:$0xff]  }
 0x4fa   :  { %1630 = vmatprep.mubr.bf16.mxu1 %v1391_v30  ;;  %v3121_v30 = vld [vmem:[#allocation7 + $0x3c4] ss:$8 sps:$4 sm:$0xff]  }
 0x4fb   :  { %1631 = vmatmul.mubr.bf16.vlgmr.msra.gmra.mrb[8].mxu1 %v1390_v28  ;;  %v3116_v28 = vld [vmem:[#allocation7 + $0x3b0] ss:$8 sps:$4 sm:$0xff]  }
 0x4fc   :  { %2181 = vmatpush1.bf16.msra.mxu1 %v3083_v37  ;;  %v3130_v37 = vld [vmem:[#allocation7 + $0x3f4] ss:$8 sps:$4 sm:$0xff]  }
 0x4fd   :  { %2182 = vmatprep.subr.bf16.mxu1 %v3088_v39  ;;  %v3131_v39 = vld [vmem:[#allocation8 + $0x1c0] sm:$0xff]  }
 0x500   :  { %2183 = vmatpush1.bf16.msra.mxu1 %v3086_v40  ;;  %v3132_v40 = vld [vmem:[#allocation8 + $0x180] sm:$0xff]  }
 0x501   :  { %2184 = vmatprep.subr.bf16.mxu1 %v3091_v42  ;;  %v3133_v42 = vld [vmem:[#allocation8 + $0x1c8] sm:$0xff]  }
 0x504   :  { %2185 = vmatpush1.bf16.msra.mxu1 %v3089_v43  ;;  %v3134_v43 = vld [vmem:[#allocation8 + $0x188] sm:$0xff]  }
 0x505   :  { %2186 = vmatprep.subr.bf16.mxu1 %v3094_v44  ;;  %v3135_v44 = vld [vmem:[#allocation8 + $0x1d0] sm:$0xff]  }
 0x508   :  { %2187 = vmatpush1.bf16.msra.mxu1 %v3092_v45  ;;  %v3136_v45 = vld [vmem:[#allocation8 + $0x190] sm:$0xff]  }
 0x509   :  { %2188 = vmatprep.subr.bf16.mxu1 %v3097_v46  ;;  %v3137_v46 = vld [vmem:[#allocation8 + $0x1d8] sm:$0xff]  }
 0x50c   :  { %2189 = vmatpush1.bf16.msra.mxu1 %v3095_v47  ;;  %v3138_v47 = vld [vmem:[#allocation8 + $0x198] sm:$0xff]  }
 0x50d   :  { %2190 = vmatprep.subr.bf16.mxu1 %v3100_v48  ;;  %v3139_v48 = vld [vmem:[#allocation8 + $0x1e0] sm:$0xff]  }
 0x510   :  { %2191 = vmatpush1.bf16.msra.mxu1 %v3098_v49  ;;  %v3140_v49 = vld [vmem:[#allocation8 + $0x1a0] sm:$0xff]  }
 0x511   :  { %2192 = vmatprep.subr.bf16.mxu1 %v3103_v17 }
 0x514   :  { %2193 = vmatpush1.bf16.msra.mxu1 %v3101_v18 }
 0x515   :  { %2194 = vmatprep.subr.bf16.mxu1 %v3106_v19 }
 0x518   :  { %2195 = vmatpush1.bf16.msra.mxu1 %v3104_v20 }
 0x519   :  { %2196 = vmatprep.subr.bf16.mxu1 %v3109_v21 }
 0x51c   :  { %2197 = vmatpush1.bf16.msra.mxu1 %v3107_v22 }
 0x51d   :  { %2198 = vmatprep.subr.bf16.mxu1 %v3112_v23 }
 0x520   :  { %2199 = vmatpush1.bf16.msra.mxu1 %v3110_v24 }
 0x521   :  { %2200 = vmatprep.subr.bf16.mxu1 %v3115_v25 }
 0x524   :  { %2201 = vmatpush1.bf16.msra.mxu1 %v3113_v26 }
 0x5ce   :  { %v1632_v53 = vpop.f32.mrb[8].mxu1 }
 0x5cf   :  { %v1633_v54 = vadd.f32 %v1632_v53, %v1431_v51  ;;  %v1634_v55 = vpop.f32.mrb[9].mxu1 }
 0x5d0   :  { %v1635_v56 = vadd.f32 %v1634_v55, %v1435_v52  ;;  %v1636_v57 = vpop.f32.mrb[10].mxu1 }
 0x5d1   :  { %v1637_v58 = vadd.f32 %v1636_v57, %v1431_v51  ;;  %v1638_v59 = vpop.f32.mrb[11].mxu1  ;;  %v1641_v61 = vmax.f32 %v1633_v54, 0.0 }
 0x5d2   :  { %v1639_v60 = vadd.f32 %v1638_v59, %v1435_v52  ;;  %v1642_v63 = vmax.f32 %v1635_v56, 0.0  ;;  %v2612_v52 = vld [vmem:[%s3446_s5 + $0x2] ss:$0 sm:$0xff] }
 0x5d3   :  { %v1643_v62 = vmax.f32 %v1637_v58, 0.0 }
 0x5d4   :  { %v1644_v1 = vmax.f32 %v1639_v60, 0.0 }
 0x5d5   :  { %v1645_v2 = vpack.c.bf16 %v1643_v62, %v1641_v61 }
 0x5d6   :  { %v1646_v3 = vpack.c.bf16 %v1644_v1, %v1642_v63 }
 0x5d8   :  { %1816 = vmatprep.mubr.bf16.mxu0 %v1646_v3 }
 0x5d9   :  { %1817 = vmatmul.mubr.bf16.vlgmr.msra.gmra.mrb[20].mxu0 %v1645_v2 }
 0x5da   :  { %1926 = vmatpush1.bf16.msra.mxu0 %v3059_v4  ;;  %1957 = vmatprep.mubr.bf16.mxu0 %v3274_v0  ;;  %v3077_v0 = vld [vmem:[#allocation5 + $0x1e0] ss:$8 sps:$4 sm:$0xff]  }
 0x5db   :  { %1927 = vmatprep.subr.bf16.mxu0 %v3064_v5 }
 0x5de   :  { %1928 = vmatpush1.bf16.msra.mxu0 %v3062_v6 }
 0x5df   :  { %1929 = vmatprep.subr.bf16.mxu0 %v3067_v7  ;;  %v3142_v7 = vld [vmem:[#allocation8 + $0x1a8] sm:$0xff]  }
 0x5e2   :  { %1930 = vmatpush1.bf16.msra.mxu0 %v3065_v8  ;;  %v3143_v8 = vld [vmem:[#allocation8 + $0x1f0] sm:$0xff]  }
 0x5e3   :  { %1931 = vmatprep.subr.bf16.mxu0 %v3070_v9  ;;  %v3144_v9 = vld [vmem:[#allocation8 + $0x1b0] sm:$0xff]  }
 0x5e6   :  { %1932 = vmatpush1.bf16.msra.mxu0 %v3068_v27  ;;  %v3145_v27 = vld [vmem:[#allocation8 + $0x1f8] sm:$0xff]  }
 0x5e7   :  { %1933 = vmatprep.subr.bf16.mxu0 %v3073_v10  ;;  %v3146_v10 = vld [vmem:[#allocation8 + $0x1b8] sm:$0xff]  }
 0x5ea   :  { %1934 = vmatpush1.bf16.msra.mxu0 %v3071_v11  ;;  %v2645_v11 = vld [vmem:[%s3444_s3 + $0x6] sm:$0x3] }
 0x5eb   :  { %1935 = vmatprep.subr.bf16.mxu0 %v3076_v12  ;;  %v2013_v12 = vrot.slane %v2645_v11, %v3382_v29  ;;  %v2679_v29 = vld [vmem:[%s3446_s5 + $0x3] ss:$0 sm:$0xff] }
 0x5ee   :  { %1936 = vmatpush1.bf16.msra.mxu0 %v3074_v13  ;;  %v2017_v13 = vrot.slane %v2645_v11, %v3387_v31 }
 0x5ef   :  { %1937 = vmatprep.subr.bf16.mxu0 %v3079_v14 }
 0x5f2   :  { %1938 = vmatpush1.bf16.msra.mxu0 %v3077_v0 }
 0x5f3   :  { %1939 = vmatprep.subr.bf16.mxu0 %v3082_v15 }
 0x5f6   :  { %1940 = vmatpush1.bf16.msra.mxu0 %v3080_v16 }
 0x5f7   :  { %2762 = vmatprep.subr.bf16.mxu0 %v3131_v39 }
 0x5f9   :  { %1958 = vmatmul.mubr.bf16.vlgmr.msra.gmra.mrb[24].mxu0 %v3402_v41  ;;  %v3118_v41 = vld [vmem:[#allocation7 + $0x3b4] ss:$8 sps:$4 sm:$0xff]  }
 0x5fa   :  { %2202 = vmatprep.subr.bf16.mxu1 %v3118_v41  ;;  %2763 = vmatpush3.bf16.msra.mxu0 %v3132_v40 }
 0x5fb   :  { %2203 = vmatpush1.bf16.msra.mxu1 %v3116_v28  ;;  %2764 = vmatprep.subr.bf16.mxu0 %v3133_v42 }
 0x5fc   :  { %2204 = vmatprep.subr.bf16.mxu1 %v3121_v30 }
 0x5fe   :  { %2765 = vmatpush3.bf16.msra.mxu0 %v3134_v43 }
 0x5ff   :  { %2205 = vmatpush1.bf16.msra.mxu1 %v3119_v32  ;;  %2766 = vmatprep.subr.bf16.mxu0 %v3135_v44 }
 0x600   :  { %2206 = vmatprep.subr.bf16.mxu1 %v3124_v33 }
 0x602   :  { %2767 = vmatpush3.bf16.msra.mxu0 %v3136_v45 }
 0x603   :  { %2207 = vmatpush1.bf16.msra.mxu1 %v3122_v34  ;;  %2768 = vmatprep.subr.bf16.mxu0 %v3137_v46 }
 0x604   :  { %2208 = vmatprep.subr.bf16.mxu1 %v3127_v35 }
 0x606   :  { %2769 = vmatpush3.bf16.msra.mxu0 %v3138_v47 }
 0x607   :  { %2209 = vmatpush1.bf16.msra.mxu1 %v3125_v36  ;;  %2770 = vmatprep.subr.bf16.mxu0 %v3139_v48 }
 0x608   :  { %2210 = vmatprep.subr.bf16.mxu1 %v3130_v37 }
 0x60a   :  { %2771 = vmatpush3.bf16.msra.mxu0 %v3140_v49 }
 0x60b   :  { %2211 = vmatpush1.bf16.msra.mxu1 %v3128_v38  ;;  %2772 = vmatprep.subr.bf16.mxu0 %v3141_v50 }
 0x60e   :  { %2773 = vmatpush3.bf16.msra.mxu0 %v3142_v7 }
 0x60f   :  { %2774 = vmatprep.subr.bf16.mxu0 %v3143_v8 }
 0x612   :  { %2775 = vmatpush3.bf16.msra.mxu0 %v3144_v9 }
 0x613   :  { %2776 = vmatprep.subr.bf16.mxu0 %v3145_v27 }
 0x616   :  { %2777 = vmatpush3.bf16.msra.mxu0 %v3146_v10 }
 0x6ac   :  { %v2756_v51 = vpop.f32.mrb[20].mxu0 }
 0x6ad   :  { %v2757_v53 = vpop.f32.mrb[21].mxu0 }
 0x6ae   :  { %v2758_v54 = vadd.f32 %v2757_v53, %v2756_v51  ;;  %v2759_v55 = vpop.f32.mrb[22].mxu0 }
 0x6af   :  { %v2760_v56 = vpop.f32.mrb[23].mxu0 }
 0x6b0   :  { %v1819_v57 = vadd.f32 %v2758_v54, %v2612_v52  ;;  %v2761_v58 = vadd.f32 %v2760_v56, %v2759_v55 }
 0x6b2   :  { %1826 = vst [vmem:[#allocation10 + $0x20] sm:$0xff] %v1819_v57  ;;  %v1822_v59 = vadd.f32 %v2761_v58, %v2612_v52 }
 0x6b4   :  { %1827 = vst [vmem:[#allocation10 + $0x28] sm:$0xff] %v1822_v59 }
 0x6cc   :  { %v1959_v60 = vpop.f32.mrb[24].mxu0 }
 0x6cd   :  { %v1961_v61 = vpop.f32.mrb[25].mxu0  ;;  %v1968_v63 = vmax.f32 %v1959_v60, 0.0 }
 0x6ce   :  { %v1963_v62 = vpop.f32.mrb[26].mxu0  ;;  %v1969_v3 = vmax.f32 %v1961_v61, 0.0 }
 0x6cf   :  { %v1970_v1 = vmax.f32 %v1963_v62, 0.0  ;;  %v1965_v2 = vpop.f32.mrb[27].mxu0 }
 0x6d0   :  { %v1971_v4 = vmax.f32 %v1965_v2, 0.0 }
 0x6d1   :  { %v1972_v5 = vpack.c.bf16 %v1970_v1, %v1968_v63 }
 0x6d2   :  { %v1973_v6 = vpack.c.bf16 %v1971_v4, %v1969_v3 }
 0x6d4   :  { %2212 = vmatprep.mubr.bf16.mxu1 %v1973_v6 }
 0x6d5   :  { %2213 = vmatmul.mubr.bf16.vlgmr.msra.gmra.mrb[12].mxu1 %v1972_v5 }
 0x7a8   :  { %v2214_v14 = vpop.f32.mrb[12].mxu1 }
 0x7a9   :  { %v2215_v0 = vadd.f32 %v2214_v14, %v2013_v12  ;;  %v2216_v15 = vpop.f32.mrb[13].mxu1 }
 0x7aa   :  { %v2217_v16 = vadd.f32 %v2216_v15, %v2017_v13  ;;  %v2218_v17 = vpop.f32.mrb[14].mxu1 }
 0x7ab   :  { %v2219_v18 = vadd.f32 %v2218_v17, %v2013_v12  ;;  %v2220_v19 = vpop.f32.mrb[15].mxu1  ;;  %v2223_v21 = vmax.f32 %v2215_v0, 0.0 }
 0x7ac   :  { %v2221_v20 = vadd.f32 %v2220_v19, %v2017_v13  ;;  %v2224_v23 = vmax.f32 %v2217_v16, 0.0 }
 0x7ad   :  { %v2225_v22 = vmax.f32 %v2219_v18, 0.0 }
 0x7ae   :  { %v2226_v24 = vmax.f32 %v2221_v20, 0.0 }
 0x7af   :  { %v2227_v25 = vpack.c.bf16 %v2225_v22, %v2223_v21 }
 0x7b0   :  { %v2228_v26 = vpack.c.bf16 %v2226_v24, %v2224_v23 }
 0x7b2   :  { %2398 = vmatprep.mubr.bf16.mxu0 %v2228_v26 }
 0x7b3   :  { %2399 = vmatmul.mubr.bf16.vlgmr.msra.gmra.mrb[28].mxu0 %v2227_v25 }
 0x886   :  { %v2778_v41 = vpop.f32.mrb[28].mxu0 }
 0x887   :  { %v2779_v31 = vpop.f32.mrb[29].mxu0 }
 0x888   :  { %v2780_v28 = vadd.f32 %v2779_v31, %v2778_v41  ;;  %v2781_v30 = vpop.f32.mrb[30].mxu0 }
 0x889   :  { %v2782_v32 = vpop.f32.mrb[31].mxu0 }
 0x88a   :  { %v2401_v33 = vadd.f32 %v2780_v28, %v2679_v29  ;;  %v2783_v34 = vadd.f32 %v2782_v32, %v2781_v30 }
 0x88c   :  { %2408 = vst [vmem:[#allocation10 + $0x30] sm:$0xff] %v2401_v33  ;;  %v2404_v35 = vadd.f32 %v2783_v34, %v2679_v29 }
 0x88e   :  { %2409 = vst [vmem:[#allocation10 + $0x38] sm:$0xff] %v2404_v35 }
 0x88f   :  { %3247 = shalt.err (!%p3244_p8)
}
 0x890   :  { %s3248_s18 = scalar_lea.hbm %s3447_s6, 1024 }
 0x891   :  { %p3249_p9 = scmp.ne.s32.totalorder %s3447_s6, %s3248_s18  ;;  %p3252_p10 = scmp.lt.u32.totalorder %s3248_s18, %s3447_s6 }
 0x893   :  { %p3254_p11 = pnand %p3252_p10, %p3249_p9 }
 0x895   :  { %3257 = shalt.err (!%p3254_p11)
}
 0x896   :  { %2421 = dma.vmem_to_hbm [thread:$0]  %s2416_s15, 1024, %s3447_s6, [#allocation4], %s3267_s7, %s3267_s7, %s3268_s8  }
 0x897   :  { %3264 = dma.done.wait [#allocation4], 1024  }
 0x898   :  { %3265 = vsyncadd [#allocation4], 4294966272 }
 0x899   :  { %2425 = vsyncpa [#allocation3], 1 }
 0x89a   :  { %2426 = vsyncpa [#allocation6], 1 }
 0x89b   :  { %2427 = vsyncpa [#allocation9], 1 }
 0x89c   :  { %2428 = vsyncpa [#allocation4], 1 }

</bundles_post_ra>
